<compile_context>
chip_gen: v7x
topology: tpu7x:2x2x1
jax: 0.10.0
libtpu: 0.0.40
codegen_flags: <defaults>
</compile_context>

<pallas_src>
import functools
import math

import jax
import jax.numpy as jnp
from jax.experimental import pallas as pl
from jax.experimental.pallas import tpu as pltpu

NEG_INF = -1e30  # large-negative stand-in for float('-inf') masking


def _round_up(x, m):
    return (x + m - 1) // m * m


def _pick(dim, cap):
    """Return (tile, padded_dim): full dim if <= cap (no padding), else cap tiles."""
    if dim <= cap:
        return dim, dim
    return cap, _round_up(dim, cap)


# ----------------------------------------------------------------------------
# Tiled matmul (+ bias, + optional ReLU): bf16 MXU inputs / f32 accumulation
# ----------------------------------------------------------------------------
def _matmul_kernel(x_ref, w_ref, b_ref, o_ref, acc_ref, *, relu):
    @pl.when(pl.program_id(2) == 0)
    def _init():
        acc_ref[...] = jnp.zeros_like(acc_ref)

    acc_ref[...] += jnp.dot(x_ref[...], w_ref[...],
                            preferred_element_type=jnp.float32)

    @pl.when(pl.program_id(2) == pl.num_programs(2) - 1)
    def _fin():
        out = acc_ref[...] + b_ref[...]
        if relu:
            out = jnp.maximum(out, 0.0)
        o_ref[...] = out.astype(o_ref.dtype)


def pallas_matmul(x, w, b=None, relu=False, out_dtype=jnp.bfloat16):
    """x: (M, K), w: (K, N) pre-cast bf16, b: (N,) f32 or None -> (M, N)."""
    M, K = x.shape
    N = w.shape[1]
    tm, Mp = _pick(M, 256)
    tk, Kp = _pick(K, 512)
    tn, Np = _pick(N, 256)

    xb = x.astype(jnp.bfloat16)
    if Mp != M or Kp != K:
        xb = jnp.pad(xb, ((0, Mp - M), (0, Kp - K)))
    wb = w.astype(jnp.bfloat16)
    if Kp != K or Np != N:
        wb = jnp.pad(wb, ((0, Kp - K), (0, Np - N)))
    if b is None:
        bb = jnp.zeros((1, Np), jnp.float32)
    else:
        bb = b.astype(jnp.float32).reshape(1, N)
        if Np != N:
            bb = jnp.pad(bb, ((0, 0), (0, Np - N)))

    out = pl.pallas_call(
        functools.partial(_matmul_kernel, relu=relu),
        out_shape=jax.ShapeDtypeStruct((Mp, Np), out_dtype),
        grid=(Mp // tm, Np // tn, Kp // tk),
        in_specs=[
            pl.BlockSpec((tm, tk), lambda i, j, k: (i, k)),
            pl.BlockSpec((tk, tn), lambda i, j, k: (k, j)),
            pl.BlockSpec((1, tn), lambda i, j, k: (0, j)),
        ],
        out_specs=pl.BlockSpec((tm, tn), lambda i, j, k: (i, j)),
        scratch_shapes=[pltpu.VMEM((tm, tn), jnp.float32)],
        compiler_params=pltpu.CompilerParams(
            dimension_semantics=("parallel", "parallel", "arbitrary")),
    )(xb, wb, bb)
    if Mp != M or Np != N:
        out = out[:M, :N]
    return out


# ----------------------------------------------------------------------------
# Fused: LayerNorm(residual + x @ w + b)   (N kept whole; tiled over M, K)
# ----------------------------------------------------------------------------
def _linear_res_ln_kernel(x_ref, w_ref, b_ref, r_ref, g_ref, bt_ref, o_ref,
                          acc_ref):
    @pl.when(pl.program_id(1) == 0)
    def _init():
        acc_ref[...] = jnp.zeros_like(acc_ref)

    acc_ref[...] += jnp.dot(x_ref[...], w_ref[...],
                            preferred_element_type=jnp.float32)

    @pl.when(pl.program_id(1) == pl.num_programs(1) - 1)
    def _fin():
        y = acc_ref[...] + b_ref[...] + r_ref[...].astype(jnp.float32)
        mu = jnp.mean(y, axis=-1, keepdims=True)
        yc = y - mu
        var = jnp.mean(yc * yc, axis=-1, keepdims=True)
        o_ref[...] = (yc * jax.lax.rsqrt(var + 1e-5) * g_ref[...]
                      + bt_ref[...]).astype(o_ref.dtype)


def pallas_linear_res_ln(x, w, b, res, gamma, beta):
    """LayerNorm(res + x @ w + b). x: (M, K) bf16, w: (K, N) bf16, res: (M, N)."""
    M, K = x.shape
    N = w.shape[1]
    tm, Mp = _pick(M, 256)
    tk, Kp = _pick(K, 512)

    xb = x.astype(jnp.bfloat16)
    rb = res.astype(jnp.bfloat16)
    if Mp != M or Kp != K:
        xb = jnp.pad(xb, ((0, Mp - M), (0, Kp - K)))
        rb = jnp.pad(rb, ((0, Mp - M), (0, 0)))
    wb = w.astype(jnp.bfloat16)
    if Kp != K:
        wb = jnp.pad(wb, ((0, Kp - K), (0, 0)))
    b2 = b.astype(jnp.float32).reshape(1, N)
    g2 = gamma.astype(jnp.float32).reshape(1, N)
    bt2 = beta.astype(jnp.float32).reshape(1, N)

    out = pl.pallas_call(
        _linear_res_ln_kernel,
        out_shape=jax.ShapeDtypeStruct((Mp, N), jnp.bfloat16),
        grid=(Mp // tm, Kp // tk),
        in_specs=[
            pl.BlockSpec((tm, tk), lambda i, k: (i, k)),
            pl.BlockSpec((tk, N), lambda i, k: (k, 0)),
            pl.BlockSpec((1, N), lambda i, k: (0, 0)),
            pl.BlockSpec((tm, N), lambda i, k: (i, 0)),
            pl.BlockSpec((1, N), lambda i, k: (0, 0)),
            pl.BlockSpec((1, N), lambda i, k: (0, 0)),
        ],
        out_specs=pl.BlockSpec((tm, N), lambda i, k: (i, 0)),
        scratch_shapes=[pltpu.VMEM((tm, N), jnp.float32)],
        compiler_params=pltpu.CompilerParams(
            dimension_semantics=("parallel", "arbitrary")),
    )(xb, wb, b2, rb, g2, bt2)
    if Mp != M:
        out = out[:M]
    return out


# ----------------------------------------------------------------------------
# Multi-head attention: one (batch, head) tile per grid step.
# Causal mask built in-kernel (iota); key-padding row passed as (B, 1, S) f32.
# ----------------------------------------------------------------------------
def _make_attn_kernel(scale, causal, has_pad, return_weights):
    def kernel(*refs):
        idx = 0
        q_ref = refs[idx]; idx += 1
        k_ref = refs[idx]; idx += 1
        v_ref = refs[idx]; idx += 1
        pad_ref = None
        if has_pad:
            pad_ref = refs[idx]; idx += 1
        o_ref = refs[idx]; idx += 1
        w_ref = refs[idx] if return_weights else None

        q = q_ref[...][0, 0]                                   # (L, dh) bf16
        k = k_ref[...][0, 0]                                   # (S, dh) bf16
        v = v_ref[...][0, 0]                                   # (S, dh) bf16

        s = jax.lax.dot_general(
            q, k, (((1,), (1,)), ((), ())),
            preferred_element_type=jnp.float32) * scale        # (L, S) f32
        if causal:
            row = jax.lax.broadcasted_iota(jnp.int32, s.shape, 0)
            col = jax.lax.broadcasted_iota(jnp.int32, s.shape, 1)
            s = jnp.where(col > row, NEG_INF, s)
        if has_pad:
            s = s + pad_ref[...][0]                            # (1, S) broadcast

        s = s - jnp.max(s, axis=-1, keepdims=True)
        p = jnp.exp(s)
        p = p * pl.reciprocal(jnp.sum(p, axis=-1, keepdims=True), approx=True)
        if return_weights:
            w_ref[...] = p.astype(w_ref.dtype)[None, None, :, :]

        o = jnp.dot(p.astype(jnp.bfloat16), v,
                    preferred_element_type=jnp.float32)        # (L, dh)
        o_ref[...] = o.astype(o_ref.dtype)[None, None, :, :]
    return kernel


def pallas_attention(q, k, v, pad_mask=None, causal=False, return_weights=False):
    """q: (B, H, L, dh), k/v: (B, H, S, dh) bf16; pad_mask: (B, 1, S) additive f32."""
    B, H, L, dh = q.shape
    S = k.shape[2]
    scale = 1.0 / math.sqrt(dh)

    args = [q, k, v]
    in_specs = [
        pl.BlockSpec((1, 1, L, dh), lambda b, h: (b, h, 0, 0)),
        pl.BlockSpec((1, 1, S, dh), lambda b, h: (b, h, 0, 0)),
        pl.BlockSpec((1, 1, S, dh), lambda b, h: (b, h, 0, 0)),
    ]
    if pad_mask is not None:
        args.append(pad_mask.astype(jnp.float32))
        in_specs.append(pl.BlockSpec((1, 1, S), lambda b, h: (b, 0, 0)))

    if return_weights:
        out_shape = (jax.ShapeDtypeStruct((B, H, L, dh), jnp.bfloat16),
                     jax.ShapeDtypeStruct((B, H, L, S), jnp.bfloat16))
        out_specs = (pl.BlockSpec((1, 1, L, dh), lambda b, h: (b, h, 0, 0)),
                     pl.BlockSpec((1, 1, L, S), lambda b, h: (b, h, 0, 0)))
    else:
        out_shape = jax.ShapeDtypeStruct((B, H, L, dh), jnp.bfloat16)
        out_specs = pl.BlockSpec((1, 1, L, dh), lambda b, h: (b, h, 0, 0))

    out = pl.pallas_call(
        _make_attn_kernel(scale, causal, pad_mask is not None, return_weights),
        out_shape=out_shape,
        grid=(B, H),
        in_specs=in_specs,
        out_specs=out_specs,
        compiler_params=pltpu.CompilerParams(
            dimension_semantics=("parallel", "parallel")),
    )(*args)
    return out


# ----------------------------------------------------------------------------
# Model glue (matches PyTorch forward semantics; dropout = identity)
# ----------------------------------------------------------------------------
def decoder_layer_forward(x_flat, enc_flat, p, pad_mask, num_heads, L, B, S):
    E = x_flat.shape[1]
    dh = E // num_heads

    # --- masked self-attention: fused QKV proj; out-proj + residual + LN fused ---
    qkv = pallas_matmul(x_flat, p["sa_in_w_t"], p["sa_in_b"])            # bf16 (L*B, 3E)
    qkv = qkv.reshape(L, B, 3, num_heads, dh).transpose(2, 1, 3, 0, 4)   # (3, B, H, L, dh)
    o = pallas_attention(qkv[0], qkv[1], qkv[2], pad_mask=pad_mask, causal=True)
    o = o.transpose(2, 0, 1, 3).reshape(L * B, E)
    x_flat = pallas_linear_res_ln(o, p["sa_out_w_t"], p["sa_out_b"],
                                  x_flat, p["ln1_g"], p["ln1_b"])

    # --- cross-attention: fused KV proj; no mask; per-head weights exported ---
    q2 = pallas_matmul(x_flat, p["ca_q_w_t"], p["ca_q_b"])               # bf16 (L*B, E)
    kv = pallas_matmul(enc_flat, p["ca_kv_w_t"], p["ca_kv_b"])           # bf16 (S*B, 2E)
    q2 = q2.reshape(L, B, num_heads, dh).transpose(1, 2, 0, 3)           # (B, H, L, dh)
    kv = kv.reshape(S, B, 2, num_heads, dh).transpose(2, 1, 3, 0, 4)     # (2, B, H, S, dh)
    o2, attns = pallas_attention(q2, kv[0], kv[1], return_weights=True)
    o2 = o2.transpose(2, 0, 1, 3).reshape(L * B, E)
    x_flat = pallas_linear_res_ln(o2, p["ca_out_w_t"], p["ca_out_b"],
                                  x_flat, p["ln2_g"], p["ln2_b"])

    # --- feed-forward: ReLU fused in first matmul; 2nd matmul + residual + LN fused ---
    h = pallas_matmul(x_flat, p["ff_w1_t"], p["ff_b1"], relu=True)
    x_flat = pallas_linear_res_ln(h, p["ff_w2_t"], p["ff_b2"],
                                  x_flat, p["ln3_g"], p["ln3_b"])

    return x_flat, attns                                                  # attns: (B, H, L, S) bf16


def patchify(images, patch):
    """images: (B, C, H, W) NCHW -> (B, num_patches, C*patch*patch)."""
    B, C, H, W = images.shape
    gh, gw = H // patch, W // patch
    x = images.reshape(B, C, gh, patch, gw, patch)
    x = x.transpose(0, 2, 4, 1, 3, 5)  # (B, gh, gw, C, p, p)
    return x.reshape(B, gh * gw, C * patch * patch)


def transformer_forward(images, captions, params, cfg):
    E, H, pad_id = cfg["d_model"], cfg["num_heads"], cfg["pad_id"]
    B, L = captions.shape

    # ---- encoder stand-in (patch embed, frozen) ----
    patches = patchify(images, cfg["patch"])                              # (B, P, pd)
    Pn = patches.shape[1]
    feat = pallas_matmul(patches.reshape(B * Pn, -1),
                         params["enc_w"], params["enc_b"])                # bf16 (B*P, E)
    enc_flat = feat.reshape(B, Pn, E).transpose(1, 0, 2).reshape(Pn * B, E)

    # ---- key-padding additive row (B, 1, L); causal part is built in-kernel ----
    pad_mask = jnp.where(captions == pad_id, NEG_INF, 0.0).astype(jnp.float32)
    pad_mask = pad_mask.reshape(B, 1, L)

    # ---- embedding + positional encoding (reproduces original pe[:, :x.size(1)]
    #      indexing, which slices by the *batch* dimension in seq-first layout) ----
    emb = params["emb"][captions]                                         # (B, L, E) f32
    x = jnp.transpose(emb, (1, 0, 2)) * math.sqrt(E) + params["pe"][:B][None, :, :]
    x_flat = x.reshape(L * B, E).astype(jnp.bfloat16)

    # ---- decoder layers ----
    attns_all = []
    for lp in params["layers"]:
        x_flat, attns = decoder_layer_forward(x_flat, enc_flat, lp, pad_mask,
                                              H, L, B, Pn)
        attns_all.append(attns)
    attns_all = jnp.stack(attns_all)                                      # (n_layers, B, H, L, P)

    # ---- predictor (no bias) ----
    V = params["pred_w_t"].shape[1]
    logits = pallas_matmul(x_flat, params["pred_w_t"], None, out_dtype=jnp.float32)
    predictions = logits.reshape(L, B, V).transpose(1, 0, 2)              # (B, L, V) f32
    return predictions, attns_all


# ----------------------------------------------------------------------------
# Deterministic parameter construction (weights pre-transposed + pre-cast bf16)
# ----------------------------------------------------------------------------
def init_params(key, cfg):
    V, E, F = cfg["vocab_size"], cfg["d_model"], cfg["ff_dim"]
    n_layers, max_len, pad_id = cfg["n_layers"], cfg["max_len"], cfg["pad_id"]
    patch_dim = 3 * cfg["patch"] * cfg["patch"]

    def nrm(k, shape, scale=0.02):
        return scale * jax.random.normal(k, shape, jnp.float32)

    def nrm16(k, shape, scale=0.02):
        return nrm(k, shape, scale).astype(jnp.bfloat16)

    keys = iter(jax.random.split(key, 8 + 16 * n_layers))
    params = {}
    emb = nrm(next(keys), (V, E))
    params["emb"] = emb.at[pad_id].set(0.0)                               # padding_idx row zero

    position = jnp.arange(max_len, dtype=jnp.float32)[:, None]
    div_term = jnp.exp(jnp.arange(0, E, 2, dtype=jnp.float32) * (-math.log(10000.0) / E))
    pe = jnp.zeros((max_len, E), jnp.float32)
    pe = pe.at[:, 0::2].set(jnp.sin(position * div_term))
    pe = pe.at[:, 1::2].set(jnp.cos(position * div_term))
    params["pe"] = pe

    params["enc_w"] = nrm16(next(keys), (patch_dim, E))
    params["enc_b"] = nrm(next(keys), (E,))
    params["pred_w_t"] = nrm16(next(keys), (E, V))                        # Linear(E, V, bias=False)

    layers = []
    for _ in range(n_layers):
        lp = {
            "sa_in_w_t": nrm16(next(keys), (E, 3 * E)), "sa_in_b": nrm(next(keys), (3 * E,)),
            "sa_out_w_t": nrm16(next(keys), (E, E)),    "sa_out_b": nrm(next(keys), (E,)),
            "ca_q_w_t": nrm16(next(keys), (E, E)),      "ca_q_b": nrm(next(keys), (E,)),
            "ca_kv_w_t": nrm16(next(keys), (E, 2 * E)), "ca_kv_b": nrm(next(keys), (2 * E,)),
            "ca_out_w_t": nrm16(next(keys), (E, E)),    "ca_out_b": nrm(next(keys), (E,)),
            "ff_w1_t": nrm16(next(keys), (E, F)),       "ff_b1": nrm(next(keys), (F,)),
            "ff_w2_t": nrm16(next(keys), (F, E)),       "ff_b2": nrm(next(keys), (E,)),
            "ln1_g": jnp.ones((E,), jnp.float32), "ln1_b": jnp.zeros((E,), jnp.float32),
            "ln2_g": jnp.ones((E,), jnp.float32), "ln2_b": jnp.zeros((E,), jnp.float32),
            "ln3_g": jnp.ones((E,), jnp.float32), "ln3_b": jnp.zeros((E,), jnp.float32),
        }
        layers.append(lp)
    params["layers"] = layers
    return params


# ----------------------------------------------------------------------------
if __name__ == "__main__":
    cfg = dict(vocab_size=50, d_model=32, ff_dim=64, n_layers=2, num_heads=4,
               max_len=64, pad_id=0, patch=4)

    key = jax.random.PRNGKey(0)
    k_param, k_img = jax.random.split(key)
    params = init_params(k_param, cfg)

    # small deterministic inputs
    images = jax.random.normal(k_img, (2, 3, 16, 16), jnp.float32)            # NCHW
    captions = jnp.array([[5, 7, 3, 0, 2, 9, 1, 4],
                          [2, 8, 6, 4, 0, 0, 3, 7]], dtype=jnp.int32)          # (B, L)

    fwd = jax.jit(functools.partial(transformer_forward, cfg=cfg))
    predictions, attns = fwd(images, captions, params)
    predictions = jax.block_until_ready(predictions)
    attns = jax.block_until_ready(attns)

    assert predictions.shape == (2, 8, cfg["vocab_size"])
    assert attns.shape == (cfg["n_layers"], 2, cfg["num_heads"], 8, 16)
    assert bool(jnp.all(jnp.isfinite(predictions))) and bool(jnp.all(jnp.isfinite(attns)))
    print("KERNEL_OK")
</pallas_src>

<mosaic_0001>
module attributes {stable_mosaic.version = 11 : i64} {
  func.func @_matmul_kernel(%arg0: i32, %arg1: i32, %arg2: i32, %arg3: memref<16x32xbf16, #tpu.memory_space<vmem>>, %arg4: memref<32x96xbf16, #tpu.memory_space<vmem>>, %arg5: memref<1x96xf32, #tpu.memory_space<vmem>>, %arg6: memref<16x96xbf16, #tpu.memory_space<vmem>>, %arg7: memref<16x96xf32, #tpu.memory_space<vmem>>) attributes {dimension_semantics = [#tpu.dimension_semantics<parallel>, #tpu.dimension_semantics<parallel>, #tpu.dimension_semantics<arbitrary>], iteration_bounds = array<i64: 1, 1, 1>, scalar_prefetch = 0 : i64, scratch_operands = 1 : i64, tpu.core_type = #tpu.core_type<tc>, window_params = [{transform_indices = @transform_0, window_bounds = array<i64: 16, 32>}, {transform_indices = @transform_1, window_bounds = array<i64: 32, 96>}, {transform_indices = @transform_2, window_bounds = array<i64: 1, 96>}, {transform_indices = @transform_3, window_bounds = array<i64: 16, 96>}]} {
    %c0_i32 = arith.constant 0 : i32
    %0 = arith.cmpi eq, %arg2, %c0_i32 : i32
    %1 = arith.extui %0 : i1 to i32
    %c0_i32_0 = arith.constant 0 : i32
    %2 = arith.cmpi ne, %1, %c0_i32_0 : i32
    scf.if %2 {
      %cst_10 = arith.constant 0.000000e+00 : f32
      %12 = vector.broadcast %cst_10 : f32 to vector<16x96xf32>
      %c0_11 = arith.constant 0 : index
      %c0_12 = arith.constant 0 : index
      %13 = vector.load %arg7[%c0_11, %c0_12] : memref<16x96xf32, #tpu.memory_space<vmem>>, vector<16x96xf32>
      tpu.vector_store %arg7[%c0_11, %c0_12], %12 {strides = array<i32>} : memref<16x96xf32, #tpu.memory_space<vmem>>, vector<16x96xf32>,
    } else {
    }
    %c0 = arith.constant 0 : index
    %c0_1 = arith.constant 0 : index
    %3 = vector.load %arg7[%c0, %c0_1] : memref<16x96xf32, #tpu.memory_space<vmem>>, vector<16x96xf32>
    %c0_2 = arith.constant 0 : index
    %c0_3 = arith.constant 0 : index
    %4 = vector.load %arg3[%c0_2, %c0_3] : memref<16x32xbf16, #tpu.memory_space<vmem>>, vector<16x32xbf16>
    %c0_4 = arith.constant 0 : index
    %c0_5 = arith.constant 0 : index
    %5 = vector.load %arg4[%c0_4, %c0_5] : memref<32x96xbf16, #tpu.memory_space<vmem>>, vector<32x96xbf16>
    %cst = arith.constant dense<0.000000e+00> : vector<16x96xf32>
    %6 = tpu.matmul %4, %5, %cst {dimension_numbers = #tpu.dot_dimension_numbers<[1], [0], [0], [1], [0, 0, 1, 1], [], []>} : vector<16x32xbf16>, vector<32x96xbf16>, vector<16x96xf32> -> vector<16x96xf32>
    %7 = arith.addf %3, %6 : vector<16x96xf32>
    %c0_6 = arith.constant 0 : index
    %c0_7 = arith.constant 0 : index
    %8 = vector.load %arg7[%c0_6, %c0_7] : memref<16x96xf32, #tpu.memory_space<vmem>>, vector<16x96xf32>
    tpu.vector_store %arg7[%c0_6, %c0_7], %7 {strides = array<i32>} : memref<16x96xf32, #tpu.memory_space<vmem>>, vector<16x96xf32>,
    %c0_i32_8 = arith.constant 0 : i32
    %9 = arith.cmpi eq, %arg2, %c0_i32_8 : i32
    %10 = arith.extui %9 : i1 to i32
    %c0_i32_9 = arith.constant 0 : i32
    %11 = arith.cmpi ne, %10, %c0_i32_9 : i32
    scf.if %11 {
      %c0_10 = arith.constant 0 : index
      %c0_11 = arith.constant 0 : index
      %12 = vector.load %arg7[%c0_10, %c0_11] : memref<16x96xf32, #tpu.memory_space<vmem>>, vector<16x96xf32>
      %c0_12 = arith.constant 0 : index
      %c0_13 = arith.constant 0 : index
      %13 = vector.load %arg5[%c0_12, %c0_13] : memref<1x96xf32, #tpu.memory_space<vmem>>, vector<1x96xf32>
      %14 = vector.broadcast %13 : vector<1x96xf32> to vector<16x96xf32>
      %15 = arith.addf %12, %14 : vector<16x96xf32>
      %16 = arith.truncf %15 : vector<16x96xf32> to vector<16x96xbf16>
      %c0_14 = arith.constant 0 : index
      %c0_15 = arith.constant 0 : index
      %17 = vector.load %arg6[%c0_14, %c0_15] : memref<16x96xbf16, #tpu.memory_space<vmem>>, vector<16x96xbf16>
      tpu.vector_store %arg6[%c0_14, %c0_15], %16 {strides = array<i32>} : memref<16x96xbf16, #tpu.memory_space<vmem>>, vector<16x96xbf16>,
    } else {
    }
    return
  }
  func.func @transform_0(%arg0: i32, %arg1: i32, %arg2: i32) -> (i32, i32) {
    %c0_i32 = arith.constant 0 : i32
    return %arg0, %arg2 : i32, i32
  }
  func.func @transform_1(%arg0: i32, %arg1: i32, %arg2: i32) -> (i32, i32) {
    %c0_i32 = arith.constant 0 : i32
    return %arg2, %arg1 : i32, i32
  }
  func.func @transform_2(%arg0: i32, %arg1: i32, %arg2: i32) -> (i32, i32) {
    %c0_i32 = arith.constant 0 : i32
    %c0_i32_0 = arith.constant 0 : i32
    return %c0_i32, %arg1 : i32, i32
  }
  func.func @transform_3(%arg0: i32, %arg1: i32, %arg2: i32) -> (i32, i32) {
    %c0_i32 = arith.constant 0 : i32
    return %arg0, %arg1 : i32, i32
  }
}

module attributes {stable_mosaic.version = 11 : i64} {
  func.func @kernel(%arg0: i32, %arg1: i32, %arg2: memref<1x1x8x8xbf16, #tpu.memory_space<vmem>>, %arg3: memref<1x1x8x8xbf16, #tpu.memory_space<vmem>>, %arg4: memref<1x1x8x8xbf16, #tpu.memory_space<vmem>>, %arg5: memref<1x1x8xf32, #tpu.memory_space<vmem>>, %arg6: memref<1x1x8x8xbf16, #tpu.memory_space<vmem>>) attributes {dimension_semantics = [#tpu.dimension_semantics<parallel>, #tpu.dimension_semantics<parallel>], iteration_bounds = array<i64: 2, 4>, scalar_prefetch = 0 : i64, scratch_operands = 0 : i64, tpu.core_type = #tpu.core_type<tc>, window_params = [{transform_indices = @transform_0, window_bounds = array<i64: 1, 1, 8, 8>}, {transform_indices = @transform_1, window_bounds = array<i64: 1, 1, 8, 8>}, {transform_indices = @transform_2, window_bounds = array<i64: 1, 1, 8, 8>}, {transform_indices = @transform_3, window_bounds = array<i64: 1, 1, 8>}, {transform_indices = @transform_4, window_bounds = array<i64: 1, 1, 8, 8>}]} {
    %c0 = arith.constant 0 : index
    %c0_0 = arith.constant 0 : index
    %c0_1 = arith.constant 0 : index
    %c0_2 = arith.constant 0 : index
    %0 = vector.load %arg2[%c0, %c0_0, %c0_1, %c0_2] : memref<1x1x8x8xbf16, #tpu.memory_space<vmem>>, vector<1x1x8x8xbf16>
    %1 = vector.shape_cast %0 : vector<1x1x8x8xbf16> to vector<8x8xbf16>
    %c0_3 = arith.constant 0 : index
    %c0_4 = arith.constant 0 : index
    %c0_5 = arith.constant 0 : index
    %c0_6 = arith.constant 0 : index
    %2 = vector.load %arg3[%c0_3, %c0_4, %c0_5, %c0_6] : memref<1x1x8x8xbf16, #tpu.memory_space<vmem>>, vector<1x1x8x8xbf16>
    %3 = vector.shape_cast %2 : vector<1x1x8x8xbf16> to vector<8x8xbf16>
    %c0_7 = arith.constant 0 : index
    %c0_8 = arith.constant 0 : index
    %c0_9 = arith.constant 0 : index
    %c0_10 = arith.constant 0 : index
    %4 = vector.load %arg4[%c0_7, %c0_8, %c0_9, %c0_10] : memref<1x1x8x8xbf16, #tpu.memory_space<vmem>>, vector<1x1x8x8xbf16>
    %5 = vector.shape_cast %4 : vector<1x1x8x8xbf16> to vector<8x8xbf16>
    %cst = arith.constant dense<0.000000e+00> : vector<8x8xf32>
    %6 = tpu.matmul %1, %3, %cst {dimension_numbers = #tpu.dot_dimension_numbers<[1], [1], [0], [0], [0, 0, 1, 0], [], []>} : vector<8x8xbf16>, vector<8x8xbf16>, vector<8x8xf32> -> vector<8x8xf32>
    %cst_11 = arith.constant 0.353553385 : f32
    %7 = vector.broadcast %cst_11 : f32 to vector<8x8xf32>
    %8 = arith.mulf %6, %7 : vector<8x8xf32>
    %9 = tpu.iota {dimensions = array<i32: 0>} : vector<8x8xi32>
    %10 = tpu.iota {dimensions = array<i32: 1>} : vector<8x8xi32>
    %11 = arith.cmpi sgt, %10, %9 : vector<8x8xi32>
    %cst_12 = arith.constant -1.000000e+30 : f32
    %12 = vector.broadcast %cst_12 : f32 to vector<8x8xf32>
    %13 = arith.select %11, %12, %8 : vector<8x8xi1>, vector<8x8xf32>
    %c0_13 = arith.constant 0 : index
    %c0_14 = arith.constant 0 : index
    %c0_15 = arith.constant 0 : index
    %14 = vector.load %arg5[%c0_13, %c0_14, %c0_15] : memref<1x1x8xf32, #tpu.memory_space<vmem>>, vector<1x1x8xf32>
    %15 = vector.shape_cast %14 : vector<1x1x8xf32> to vector<1x8xf32>
    %16 = vector.broadcast %15 : vector<1x8xf32> to vector<8x8xf32>
    %17 = arith.addf %13, %16 : vector<8x8xf32>
    %cst_16 = arith.constant dense<0xFF800000> : vector<8xf32>
    %18 = vector.multi_reduction <maximumf>, %17, %cst_16 [1] : vector<8x8xf32> to vector<8xf32>
    %19 = vector.shape_cast %18 : vector<8xf32> to vector<8x1xf32>
    %20 = vector.broadcast %19 : vector<8x1xf32> to vector<8x8xf32>
    %21 = arith.subf %17, %20 : vector<8x8xf32>
    %22 = math.exp %21 : vector<8x8xf32>
    %cst_17 = arith.constant dense<0.000000e+00> : vector<8xf32>
    %23 = vector.multi_reduction <add>, %22, %cst_17 [1] : vector<8x8xf32> to vector<8xf32>
    %24 = vector.shape_cast %23 : vector<8xf32> to vector<8x1xf32>
    %25 = tpu.reciprocal %24 {approx = true} : vector<8x1xf32> -> vector<8x1xf32>
    %26 = vector.broadcast %25 : vector<8x1xf32> to vector<8x8xf32>
    %27 = arith.mulf %22, %26 : vector<8x8xf32>
    %28 = arith.truncf %27 : vector<8x8xf32> to vector<8x8xbf16>
    %cst_18 = arith.constant dense<0.000000e+00> : vector<8x8xf32>
    %29 = tpu.matmul %28, %5, %cst_18 {dimension_numbers = #tpu.dot_dimension_numbers<[1], [0], [0], [1], [0, 0, 1, 1], [], []>} : vector<8x8xbf16>, vector<8x8xbf16>, vector<8x8xf32> -> vector<8x8xf32>
    %30 = arith.truncf %29 : vector<8x8xf32> to vector<8x8xbf16>
    %31 = vector.shape_cast %30 : vector<8x8xbf16> to vector<1x1x8x8xbf16>
    %c0_19 = arith.constant 0 : index
    %c0_20 = arith.constant 0 : index
    %c0_21 = arith.constant 0 : index
    %c0_22 = arith.constant 0 : index
    %32 = vector.load %arg6[%c0_19, %c0_20, %c0_21, %c0_22] : memref<1x1x8x8xbf16, #tpu.memory_space<vmem>>, vector<1x1x8x8xbf16>
    tpu.vector_store %arg6[%c0_19, %c0_20, %c0_21, %c0_22], %31 {strides = array<i32>} : memref<1x1x8x8xbf16, #tpu.memory_space<vmem>>, vector<1x1x8x8xbf16>,
    return
  }
  func.func @transform_0(%arg0: i32, %arg1: i32) -> (i32, i32, i32, i32) {
    %c0_i32 = arith.constant 0 : i32
    %c0_i32_0 = arith.constant 0 : i32
    %c0_i32_1 = arith.constant 0 : i32
    return %arg0, %arg1, %c0_i32, %c0_i32_0 : i32, i32, i32, i32
  }
  func.func @transform_1(%arg0: i32, %arg1: i32) -> (i32, i32, i32, i32) {
    %c0_i32 = arith.constant 0 : i32
    %c0_i32_0 = arith.constant 0 : i32
    %c0_i32_1 = arith.constant 0 : i32
    return %arg0, %arg1, %c0_i32, %c0_i32_0 : i32, i32, i32, i32
  }
  func.func @transform_2(%arg0: i32, %arg1: i32) -> (i32, i32, i32, i32) {
    %c0_i32 = arith.constant 0 : i32
    %c0_i32_0 = arith.constant 0 : i32
    %c0_i32_1 = arith.constant 0 : i32
    return %arg0, %arg1, %c0_i32, %c0_i32_0 : i32, i32, i32, i32
  }
  func.func @transform_3(%arg0: i32, %arg1: i32) -> (i32, i32, i32) {
    %c0_i32 = arith.constant 0 : i32
    %c0_i32_0 = arith.constant 0 : i32
    %c0_i32_1 = arith.constant 0 : i32
    return %arg0, %c0_i32, %c0_i32_0 : i32, i32, i32
  }
  func.func @transform_4(%arg0: i32, %arg1: i32) -> (i32, i32, i32, i32) {
    %c0_i32 = arith.constant 0 : i32
    %c0_i32_0 = arith.constant 0 : i32
    %c0_i32_1 = arith.constant 0 : i32
    return %arg0, %arg1, %c0_i32, %c0_i32_0 : i32, i32, i32, i32
  }
}

module attributes {stable_mosaic.version = 11 : i64} {
  func.func @_linear_res_ln_kernel(%arg0: i32, %arg1: i32, %arg2: memref<16x32xbf16, #tpu.memory_space<vmem>>, %arg3: memref<32x32xbf16, #tpu.memory_space<vmem>>, %arg4: memref<1x32xf32, #tpu.memory_space<vmem>>, %arg5: memref<16x32xbf16, #tpu.memory_space<vmem>>, %arg6: memref<1x32xf32, #tpu.memory_space<vmem>>, %arg7: memref<1x32xf32, #tpu.memory_space<vmem>>, %arg8: memref<16x32xbf16, #tpu.memory_space<vmem>>, %arg9: memref<16x32xf32, #tpu.memory_space<vmem>>) attributes {dimension_semantics = [#tpu.dimension_semantics<parallel>, #tpu.dimension_semantics<arbitrary>], iteration_bounds = array<i64: 1, 1>, scalar_prefetch = 0 : i64, scratch_operands = 1 : i64, tpu.core_type = #tpu.core_type<tc>, window_params = [{transform_indices = @transform_0, window_bounds = array<i64: 16, 32>}, {transform_indices = @transform_1, window_bounds = array<i64: 32, 32>}, {pipeline_mode = #tpu.pipeline_mode<synchronous>, transform_indices = @transform_2, window_bounds = array<i64: 1, 32>}, {transform_indices = @transform_3, window_bounds = array<i64: 16, 32>}, {pipeline_mode = #tpu.pipeline_mode<synchronous>, transform_indices = @transform_4, window_bounds = array<i64: 1, 32>}, {pipeline_mode = #tpu.pipeline_mode<synchronous>, transform_indices = @transform_5, window_bounds = array<i64: 1, 32>}, {transform_indices = @transform_6, window_bounds = array<i64: 16, 32>}]} {
    %c0_i32 = arith.constant 0 : i32
    %0 = arith.cmpi eq, %arg1, %c0_i32 : i32
    %1 = arith.extui %0 : i1 to i32
    %c0_i32_0 = arith.constant 0 : i32
    %2 = arith.cmpi ne, %1, %c0_i32_0 : i32
    scf.if %2 {
      %cst_10 = arith.constant 0.000000e+00 : f32
      %12 = vector.broadcast %cst_10 : f32 to vector<16x32xf32>
      %c0_11 = arith.constant 0 : index
      %c0_12 = arith.constant 0 : index
      %13 = vector.load %arg9[%c0_11, %c0_12] : memref<16x32xf32, #tpu.memory_space<vmem>>, vector<16x32xf32>
      tpu.vector_store %arg9[%c0_11, %c0_12], %12 {strides = array<i32>} : memref<16x32xf32, #tpu.memory_space<vmem>>, vector<16x32xf32>,
    } else {
    }
    %c0 = arith.constant 0 : index
    %c0_1 = arith.constant 0 : index
    %3 = vector.load %arg9[%c0, %c0_1] : memref<16x32xf32, #tpu.memory_space<vmem>>, vector<16x32xf32>
    %c0_2 = arith.constant 0 : index
    %c0_3 = arith.constant 0 : index
    %4 = vector.load %arg2[%c0_2, %c0_3] : memref<16x32xbf16, #tpu.memory_space<vmem>>, vector<16x32xbf16>
    %c0_4 = arith.constant 0 : index
    %c0_5 = arith.constant 0 : index
    %5 = vector.load %arg3[%c0_4, %c0_5] : memref<32x32xbf16, #tpu.memory_space<vmem>>, vector<32x32xbf16>
    %cst = arith.constant dense<0.000000e+00> : vector<16x32xf32>
    %6 = tpu.matmul %4, %5, %cst {dimension_numbers = #tpu.dot_dimension_numbers<[1], [0], [0], [1], [0, 0, 1, 1], [], []>} : vector<16x32xbf16>, vector<32x32xbf16>, vector<16x32xf32> -> vector<16x32xf32>
    %7 = arith.addf %3, %6 : vector<16x32xf32>
    %c0_6 = arith.constant 0 : index
    %c0_7 = arith.constant 0 : index
    %8 = vector.load %arg9[%c0_6, %c0_7] : memref<16x32xf32, #tpu.memory_space<vmem>>, vector<16x32xf32>
    tpu.vector_store %arg9[%c0_6, %c0_7], %7 {strides = array<i32>} : memref<16x32xf32, #tpu.memory_space<vmem>>, vector<16x32xf32>,
    %c0_i32_8 = arith.constant 0 : i32
    %9 = arith.cmpi eq, %arg1, %c0_i32_8 : i32
    %10 = arith.extui %9 : i1 to i32
    %c0_i32_9 = arith.constant 0 : i32
    %11 = arith.cmpi ne, %10, %c0_i32_9 : i32
    scf.if %11 {
      %c0_10 = arith.constant 0 : index
      %c0_11 = arith.constant 0 : index
      %12 = vector.load %arg9[%c0_10, %c0_11] : memref<16x32xf32, #tpu.memory_space<vmem>>, vector<16x32xf32>
      %c0_12 = arith.constant 0 : index
      %c0_13 = arith.constant 0 : index
      %13 = vector.load %arg4[%c0_12, %c0_13] : memref<1x32xf32, #tpu.memory_space<vmem>>, vector<1x32xf32>
      %14 = vector.broadcast %13 : vector<1x32xf32> to vector<16x32xf32>
      %15 = arith.addf %12, %14 : vector<16x32xf32>
      %c0_14 = arith.constant 0 : index
      %c0_15 = arith.constant 0 : index
      %16 = vector.load %arg5[%c0_14, %c0_15] : memref<16x32xbf16, #tpu.memory_space<vmem>>, vector<16x32xbf16>
      %17 = arith.extf %16 : vector<16x32xbf16> to vector<16x32xf32>
      %18 = arith.addf %15, %17 : vector<16x32xf32>
      %cst_16 = arith.constant dense<0.000000e+00> : vector<16xf32>
      %19 = vector.multi_reduction <add>, %18, %cst_16 [1] : vector<16x32xf32> to vector<16xf32>
      %20 = vector.shape_cast %19 : vector<16xf32> to vector<16x1xf32>
      %cst_17 = arith.constant 3.200000e+01 : f32
      %21 = vector.broadcast %cst_17 : f32 to vector<16x1xf32>
      %22 = arith.divf %20, %21 : vector<16x1xf32>
      %23 = vector.broadcast %22 : vector<16x1xf32> to vector<16x32xf32>
      %24 = arith.subf %18, %23 : vector<16x32xf32>
      %25 = arith.mulf %24, %24 : vector<16x32xf32>
      %cst_18 = arith.constant dense<0.000000e+00> : vector<16xf32>
      %26 = vector.multi_reduction <add>, %25, %cst_18 [1] : vector<16x32xf32> to vector<16xf32>
      %27 = vector.shape_cast %26 : vector<16xf32> to vector<16x1xf32>
      %cst_19 = arith.constant 3.200000e+01 : f32
      %28 = vector.broadcast %cst_19 : f32 to vector<16x1xf32>
      %29 = arith.divf %27, %28 : vector<16x1xf32>
      %cst_20 = arith.constant 9.99999974E-6 : f32
      %30 = vector.broadcast %cst_20 : f32 to vector<16x1xf32>
      %31 = arith.addf %29, %30 : vector<16x1xf32>
      %32 = math.rsqrt %31 : vector<16x1xf32>
      %33 = vector.broadcast %32 : vector<16x1xf32> to vector<16x32xf32>
      %34 = arith.mulf %24, %33 : vector<16x32xf32>
      %c0_21 = arith.constant 0 : index
      %c0_22 = arith.constant 0 : index
      %35 = vector.load %arg6[%c0_21, %c0_22] : memref<1x32xf32, #tpu.memory_space<vmem>>, vector<1x32xf32>
      %36 = vector.broadcast %35 : vector<1x32xf32> to vector<16x32xf32>
      %37 = arith.mulf %34, %36 : vector<16x32xf32>
      %c0_23 = arith.constant 0 : index
      %c0_24 = arith.constant 0 : index
      %38 = vector.load %arg7[%c0_23, %c0_24] : memref<1x32xf32, #tpu.memory_space<vmem>>, vector<1x32xf32>
      %39 = vector.broadcast %38 : vector<1x32xf32> to vector<16x32xf32>
      %40 = arith.addf %37, %39 : vector<16x32xf32>
      %41 = arith.truncf %40 : vector<16x32xf32> to vector<16x32xbf16>
      %c0_25 = arith.constant 0 : index
      %c0_26 = arith.constant 0 : index
      %42 = vector.load %arg8[%c0_25, %c0_26] : memref<16x32xbf16, #tpu.memory_space<vmem>>, vector<16x32xbf16>
      tpu.vector_store %arg8[%c0_25, %c0_26], %41 {strides = array<i32>} : memref<16x32xbf16, #tpu.memory_space<vmem>>, vector<16x32xbf16>,
    } else {
    }
    return
  }
  func.func @transform_0(%arg0: i32, %arg1: i32) -> (i32, i32) {
    %c0_i32 = arith.constant 0 : i32
    return %arg0, %arg1 : i32, i32
  }
  func.func @transform_1(%arg0: i32, %arg1: i32) -> (i32, i32) {
    %c0_i32 = arith.constant 0 : i32
    %c0_i32_0 = arith.constant 0 : i32
    return %arg1, %c0_i32 : i32, i32
  }
  func.func @transform_2(%arg0: i32, %arg1: i32) -> (i32, i32) {
    %c0_i32 = arith.constant 0 : i32
    %c0_i32_0 = arith.constant 0 : i32
    %c0_i32_1 = arith.constant 0 : i32
    return %c0_i32, %c0_i32_0 : i32, i32
  }
  func.func @transform_3(%arg0: i32, %arg1: i32) -> (i32, i32) {
    %c0_i32 = arith.constant 0 : i32
    %c0_i32_0 = arith.constant 0 : i32
    return %arg0, %c0_i32 : i32, i32
  }
  func.func @transform_4(%arg0: i32, %arg1: i32) -> (i32, i32) {
    %c0_i32 = arith.constant 0 : i32
    %c0_i32_0 = arith.constant 0 : i32
    %c0_i32_1 = arith.constant 0 : i32
    return %c0_i32, %c0_i32_0 : i32, i32
  }
  func.func @transform_5(%arg0: i32, %arg1: i32) -> (i32, i32) {
    %c0_i32 = arith.constant 0 : i32
    %c0_i32_0 = arith.constant 0 : i32
    %c0_i32_1 = arith.constant 0 : i32
    return %c0_i32, %c0_i32_0 : i32, i32
  }
  func.func @transform_6(%arg0: i32, %arg1: i32) -> (i32, i32) {
    %c0_i32 = arith.constant 0 : i32
    %c0_i32_0 = arith.constant 0 : i32
    return %arg0, %c0_i32 : i32, i32
  }
}

module attributes {stable_mosaic.version = 11 : i64} {
  func.func @_matmul_kernel(%arg0: i32, %arg1: i32, %arg2: i32, %arg3: memref<16x32xbf16, #tpu.memory_space<vmem>>, %arg4: memref<32x32xbf16, #tpu.memory_space<vmem>>, %arg5: memref<1x32xf32, #tpu.memory_space<vmem>>, %arg6: memref<16x32xbf16, #tpu.memory_space<vmem>>, %arg7: memref<16x32xf32, #tpu.memory_space<vmem>>) attributes {dimension_semantics = [#tpu.dimension_semantics<parallel>, #tpu.dimension_semantics<parallel>, #tpu.dimension_semantics<arbitrary>], iteration_bounds = array<i64: 1, 1, 1>, scalar_prefetch = 0 : i64, scratch_operands = 1 : i64, tpu.core_type = #tpu.core_type<tc>, window_params = [{transform_indices = @transform_0, window_bounds = array<i64: 16, 32>}, {transform_indices = @transform_1, window_bounds = array<i64: 32, 32>}, {transform_indices = @transform_2, window_bounds = array<i64: 1, 32>}, {transform_indices = @transform_3, window_bounds = array<i64: 16, 32>}]} {
    %c0_i32 = arith.constant 0 : i32
    %0 = arith.cmpi eq, %arg2, %c0_i32 : i32
    %1 = arith.extui %0 : i1 to i32
    %c0_i32_0 = arith.constant 0 : i32
    %2 = arith.cmpi ne, %1, %c0_i32_0 : i32
    scf.if %2 {
      %cst_10 = arith.constant 0.000000e+00 : f32
      %12 = vector.broadcast %cst_10 : f32 to vector<16x32xf32>
      %c0_11 = arith.constant 0 : index
      %c0_12 = arith.constant 0 : index
      %13 = vector.load %arg7[%c0_11, %c0_12] : memref<16x32xf32, #tpu.memory_space<vmem>>, vector<16x32xf32>
      tpu.vector_store %arg7[%c0_11, %c0_12], %12 {strides = array<i32>} : memref<16x32xf32, #tpu.memory_space<vmem>>, vector<16x32xf32>,
    } else {
    }
    %c0 = arith.constant 0 : index
    %c0_1 = arith.constant 0 : index
    %3 = vector.load %arg7[%c0, %c0_1] : memref<16x32xf32, #tpu.memory_space<vmem>>, vector<16x32xf32>
    %c0_2 = arith.constant 0 : index
    %c0_3 = arith.constant 0 : index
    %4 = vector.load %arg3[%c0_2, %c0_3] : memref<16x32xbf16, #tpu.memory_space<vmem>>, vector<16x32xbf16>
    %c0_4 = arith.constant 0 : index
    %c0_5 = arith.constant 0 : index
    %5 = vector.load %arg4[%c0_4, %c0_5] : memref<32x32xbf16, #tpu.memory_space<vmem>>, vector<32x32xbf16>
    %cst = arith.constant dense<0.000000e+00> : vector<16x32xf32>
    %6 = tpu.matmul %4, %5, %cst {dimension_numbers = #tpu.dot_dimension_numbers<[1], [0], [0], [1], [0, 0, 1, 1], [], []>} : vector<16x32xbf16>, vector<32x32xbf16>, vector<16x32xf32> -> vector<16x32xf32>
    %7 = arith.addf %3, %6 : vector<16x32xf32>
    %c0_6 = arith.constant 0 : index
    %c0_7 = arith.constant 0 : index
    %8 = vector.load %arg7[%c0_6, %c0_7] : memref<16x32xf32, #tpu.memory_space<vmem>>, vector<16x32xf32>
    tpu.vector_store %arg7[%c0_6, %c0_7], %7 {strides = array<i32>} : memref<16x32xf32, #tpu.memory_space<vmem>>, vector<16x32xf32>,
    %c0_i32_8 = arith.constant 0 : i32
    %9 = arith.cmpi eq, %arg2, %c0_i32_8 : i32
    %10 = arith.extui %9 : i1 to i32
    %c0_i32_9 = arith.constant 0 : i32
    %11 = arith.cmpi ne, %10, %c0_i32_9 : i32
    scf.if %11 {
      %c0_10 = arith.constant 0 : index
      %c0_11 = arith.constant 0 : index
      %12 = vector.load %arg7[%c0_10, %c0_11] : memref<16x32xf32, #tpu.memory_space<vmem>>, vector<16x32xf32>
      %c0_12 = arith.constant 0 : index
      %c0_13 = arith.constant 0 : index
      %13 = vector.load %arg5[%c0_12, %c0_13] : memref<1x32xf32, #tpu.memory_space<vmem>>, vector<1x32xf32>
      %14 = vector.broadcast %13 : vector<1x32xf32> to vector<16x32xf32>
      %15 = arith.addf %12, %14 : vector<16x32xf32>
      %16 = arith.truncf %15 : vector<16x32xf32> to vector<16x32xbf16>
      %c0_14 = arith.constant 0 : index
      %c0_15 = arith.constant 0 : index
      %17 = vector.load %arg6[%c0_14, %c0_15] : memref<16x32xbf16, #tpu.memory_space<vmem>>, vector<16x32xbf16>
      tpu.vector_store %arg6[%c0_14, %c0_15], %16 {strides = array<i32>} : memref<16x32xbf16, #tpu.memory_space<vmem>>, vector<16x32xbf16>,
    } else {
    }
    return
  }
  func.func @transform_0(%arg0: i32, %arg1: i32, %arg2: i32) -> (i32, i32) {
    %c0_i32 = arith.constant 0 : i32
    return %arg0, %arg2 : i32, i32
  }
  func.func @transform_1(%arg0: i32, %arg1: i32, %arg2: i32) -> (i32, i32) {
    %c0_i32 = arith.constant 0 : i32
    return %arg2, %arg1 : i32, i32
  }
  func.func @transform_2(%arg0: i32, %arg1: i32, %arg2: i32) -> (i32, i32) {
    %c0_i32 = arith.constant 0 : i32
    %c0_i32_0 = arith.constant 0 : i32
    return %c0_i32, %arg1 : i32, i32
  }
  func.func @transform_3(%arg0: i32, %arg1: i32, %arg2: i32) -> (i32, i32) {
    %c0_i32 = arith.constant 0 : i32
    return %arg0, %arg1 : i32, i32
  }
}

module attributes {stable_mosaic.version = 11 : i64} {
  func.func @_matmul_kernel(%arg0: i32, %arg1: i32, %arg2: i32, %arg3: memref<32x48xbf16, #tpu.memory_space<vmem>>, %arg4: memref<48x32xbf16, #tpu.memory_space<vmem>>, %arg5: memref<1x32xf32, #tpu.memory_space<vmem>>, %arg6: memref<32x32xbf16, #tpu.memory_space<vmem>>, %arg7: memref<32x32xf32, #tpu.memory_space<vmem>>) attributes {dimension_semantics = [#tpu.dimension_semantics<parallel>, #tpu.dimension_semantics<parallel>, #tpu.dimension_semantics<arbitrary>], iteration_bounds = array<i64: 1, 1, 1>, scalar_prefetch = 0 : i64, scratch_operands = 1 : i64, tpu.core_type = #tpu.core_type<tc>, window_params = [{transform_indices = @transform_0, window_bounds = array<i64: 32, 48>}, {transform_indices = @transform_1, window_bounds = array<i64: 48, 32>}, {transform_indices = @transform_2, window_bounds = array<i64: 1, 32>}, {transform_indices = @transform_3, window_bounds = array<i64: 32, 32>}]} {
    %c0_i32 = arith.constant 0 : i32
    %0 = arith.cmpi eq, %arg2, %c0_i32 : i32
    %1 = arith.extui %0 : i1 to i32
    %c0_i32_0 = arith.constant 0 : i32
    %2 = arith.cmpi ne, %1, %c0_i32_0 : i32
    scf.if %2 {
      %cst_10 = arith.constant 0.000000e+00 : f32
      %12 = vector.broadcast %cst_10 : f32 to vector<32x32xf32>
      %c0_11 = arith.constant 0 : index
      %c0_12 = arith.constant 0 : index
      %13 = vector.load %arg7[%c0_11, %c0_12] : memref<32x32xf32, #tpu.memory_space<vmem>>, vector<32x32xf32>
      tpu.vector_store %arg7[%c0_11, %c0_12], %12 {strides = array<i32>} : memref<32x32xf32, #tpu.memory_space<vmem>>, vector<32x32xf32>,
    } else {
    }
    %c0 = arith.constant 0 : index
    %c0_1 = arith.constant 0 : index
    %3 = vector.load %arg7[%c0, %c0_1] : memref<32x32xf32, #tpu.memory_space<vmem>>, vector<32x32xf32>
    %c0_2 = arith.constant 0 : index
    %c0_3 = arith.constant 0 : index
    %4 = vector.load %arg3[%c0_2, %c0_3] : memref<32x48xbf16, #tpu.memory_space<vmem>>, vector<32x48xbf16>
    %c0_4 = arith.constant 0 : index
    %c0_5 = arith.constant 0 : index
    %5 = vector.load %arg4[%c0_4, %c0_5] : memref<48x32xbf16, #tpu.memory_space<vmem>>, vector<48x32xbf16>
    %cst = arith.constant dense<0.000000e+00> : vector<32x32xf32>
    %6 = tpu.matmul %4, %5, %cst {dimension_numbers = #tpu.dot_dimension_numbers<[1], [0], [0], [1], [0, 0, 1, 1], [], []>} : vector<32x48xbf16>, vector<48x32xbf16>, vector<32x32xf32> -> vector<32x32xf32>
    %7 = arith.addf %3, %6 : vector<32x32xf32>
    %c0_6 = arith.constant 0 : index
    %c0_7 = arith.constant 0 : index
    %8 = vector.load %arg7[%c0_6, %c0_7] : memref<32x32xf32, #tpu.memory_space<vmem>>, vector<32x32xf32>
    tpu.vector_store %arg7[%c0_6, %c0_7], %7 {strides = array<i32>} : memref<32x32xf32, #tpu.memory_space<vmem>>, vector<32x32xf32>,
    %c0_i32_8 = arith.constant 0 : i32
    %9 = arith.cmpi eq, %arg2, %c0_i32_8 : i32
    %10 = arith.extui %9 : i1 to i32
    %c0_i32_9 = arith.constant 0 : i32
    %11 = arith.cmpi ne, %10, %c0_i32_9 : i32
    scf.if %11 {
      %c0_10 = arith.constant 0 : index
      %c0_11 = arith.constant 0 : index
      %12 = vector.load %arg7[%c0_10, %c0_11] : memref<32x32xf32, #tpu.memory_space<vmem>>, vector<32x32xf32>
      %c0_12 = arith.constant 0 : index
      %c0_13 = arith.constant 0 : index
      %13 = vector.load %arg5[%c0_12, %c0_13] : memref<1x32xf32, #tpu.memory_space<vmem>>, vector<1x32xf32>
      %14 = vector.broadcast %13 : vector<1x32xf32> to vector<32x32xf32>
      %15 = arith.addf %12, %14 : vector<32x32xf32>
      %16 = arith.truncf %15 : vector<32x32xf32> to vector<32x32xbf16>
      %c0_14 = arith.constant 0 : index
      %c0_15 = arith.constant 0 : index
      %17 = vector.load %arg6[%c0_14, %c0_15] : memref<32x32xbf16, #tpu.memory_space<vmem>>, vector<32x32xbf16>
      tpu.vector_store %arg6[%c0_14, %c0_15], %16 {strides = array<i32>} : memref<32x32xbf16, #tpu.memory_space<vmem>>, vector<32x32xbf16>,
    } else {
    }
    return
  }
  func.func @transform_0(%arg0: i32, %arg1: i32, %arg2: i32) -> (i32, i32) {
    %c0_i32 = arith.constant 0 : i32
    return %arg0, %arg2 : i32, i32
  }
  func.func @transform_1(%arg0: i32, %arg1: i32, %arg2: i32) -> (i32, i32) {
    %c0_i32 = arith.constant 0 : i32
    return %arg2, %arg1 : i32, i32
  }
  func.func @transform_2(%arg0: i32, %arg1: i32, %arg2: i32) -> (i32, i32) {
    %c0_i32 = arith.constant 0 : i32
    %c0_i32_0 = arith.constant 0 : i32
    return %c0_i32, %arg1 : i32, i32
  }
  func.func @transform_3(%arg0: i32, %arg1: i32, %arg2: i32) -> (i32, i32) {
    %c0_i32 = arith.constant 0 : i32
    return %arg0, %arg1 : i32, i32
  }
}

module attributes {stable_mosaic.version = 11 : i64} {
  func.func @_matmul_kernel(%arg0: i32, %arg1: i32, %arg2: i32, %arg3: memref<32x32xbf16, #tpu.memory_space<vmem>>, %arg4: memref<32x64xbf16, #tpu.memory_space<vmem>>, %arg5: memref<1x64xf32, #tpu.memory_space<vmem>>, %arg6: memref<32x64xbf16, #tpu.memory_space<vmem>>, %arg7: memref<32x64xf32, #tpu.memory_space<vmem>>) attributes {dimension_semantics = [#tpu.dimension_semantics<parallel>, #tpu.dimension_semantics<parallel>, #tpu.dimension_semantics<arbitrary>], iteration_bounds = array<i64: 1, 1, 1>, scalar_prefetch = 0 : i64, scratch_operands = 1 : i64, tpu.core_type = #tpu.core_type<tc>, window_params = [{transform_indices = @transform_0, window_bounds = array<i64: 32, 32>}, {transform_indices = @transform_1, window_bounds = array<i64: 32, 64>}, {transform_indices = @transform_2, window_bounds = array<i64: 1, 64>}, {transform_indices = @transform_3, window_bounds = array<i64: 32, 64>}]} {
    %c0_i32 = arith.constant 0 : i32
    %0 = arith.cmpi eq, %arg2, %c0_i32 : i32
    %1 = arith.extui %0 : i1 to i32
    %c0_i32_0 = arith.constant 0 : i32
    %2 = arith.cmpi ne, %1, %c0_i32_0 : i32
    scf.if %2 {
      %cst_10 = arith.constant 0.000000e+00 : f32
      %12 = vector.broadcast %cst_10 : f32 to vector<32x64xf32>
      %c0_11 = arith.constant 0 : index
      %c0_12 = arith.constant 0 : index
      %13 = vector.load %arg7[%c0_11, %c0_12] : memref<32x64xf32, #tpu.memory_space<vmem>>, vector<32x64xf32>
      tpu.vector_store %arg7[%c0_11, %c0_12], %12 {strides = array<i32>} : memref<32x64xf32, #tpu.memory_space<vmem>>, vector<32x64xf32>,
    } else {
    }
    %c0 = arith.constant 0 : index
    %c0_1 = arith.constant 0 : index
    %3 = vector.load %arg7[%c0, %c0_1] : memref<32x64xf32, #tpu.memory_space<vmem>>, vector<32x64xf32>
    %c0_2 = arith.constant 0 : index
    %c0_3 = arith.constant 0 : index
    %4 = vector.load %arg3[%c0_2, %c0_3] : memref<32x32xbf16, #tpu.memory_space<vmem>>, vector<32x32xbf16>
    %c0_4 = arith.constant 0 : index
    %c0_5 = arith.constant 0 : index
    %5 = vector.load %arg4[%c0_4, %c0_5] : memref<32x64xbf16, #tpu.memory_space<vmem>>, vector<32x64xbf16>
    %cst = arith.constant dense<0.000000e+00> : vector<32x64xf32>
    %6 = tpu.matmul %4, %5, %cst {dimension_numbers = #tpu.dot_dimension_numbers<[1], [0], [0], [1], [0, 0, 1, 1], [], []>} : vector<32x32xbf16>, vector<32x64xbf16>, vector<32x64xf32> -> vector<32x64xf32>
    %7 = arith.addf %3, %6 : vector<32x64xf32>
    %c0_6 = arith.constant 0 : index
    %c0_7 = arith.constant 0 : index
    %8 = vector.load %arg7[%c0_6, %c0_7] : memref<32x64xf32, #tpu.memory_space<vmem>>, vector<32x64xf32>
    tpu.vector_store %arg7[%c0_6, %c0_7], %7 {strides = array<i32>} : memref<32x64xf32, #tpu.memory_space<vmem>>, vector<32x64xf32>,
    %c0_i32_8 = arith.constant 0 : i32
    %9 = arith.cmpi eq, %arg2, %c0_i32_8 : i32
    %10 = arith.extui %9 : i1 to i32
    %c0_i32_9 = arith.constant 0 : i32
    %11 = arith.cmpi ne, %10, %c0_i32_9 : i32
    scf.if %11 {
      %c0_10 = arith.constant 0 : index
      %c0_11 = arith.constant 0 : index
      %12 = vector.load %arg7[%c0_10, %c0_11] : memref<32x64xf32, #tpu.memory_space<vmem>>, vector<32x64xf32>
      %c0_12 = arith.constant 0 : index
      %c0_13 = arith.constant 0 : index
      %13 = vector.load %arg5[%c0_12, %c0_13] : memref<1x64xf32, #tpu.memory_space<vmem>>, vector<1x64xf32>
      %14 = vector.broadcast %13 : vector<1x64xf32> to vector<32x64xf32>
      %15 = arith.addf %12, %14 : vector<32x64xf32>
      %16 = arith.truncf %15 : vector<32x64xf32> to vector<32x64xbf16>
      %c0_14 = arith.constant 0 : index
      %c0_15 = arith.constant 0 : index
      %17 = vector.load %arg6[%c0_14, %c0_15] : memref<32x64xbf16, #tpu.memory_space<vmem>>, vector<32x64xbf16>
      tpu.vector_store %arg6[%c0_14, %c0_15], %16 {strides = array<i32>} : memref<32x64xbf16, #tpu.memory_space<vmem>>, vector<32x64xbf16>,
    } else {
    }
    return
  }
  func.func @transform_0(%arg0: i32, %arg1: i32, %arg2: i32) -> (i32, i32) {
    %c0_i32 = arith.constant 0 : i32
    return %arg0, %arg2 : i32, i32
  }
  func.func @transform_1(%arg0: i32, %arg1: i32, %arg2: i32) -> (i32, i32) {
    %c0_i32 = arith.constant 0 : i32
    return %arg2, %arg1 : i32, i32
  }
  func.func @transform_2(%arg0: i32, %arg1: i32, %arg2: i32) -> (i32, i32) {
    %c0_i32 = arith.constant 0 : i32
    %c0_i32_0 = arith.constant 0 : i32
    return %c0_i32, %arg1 : i32, i32
  }
  func.func @transform_3(%arg0: i32, %arg1: i32, %arg2: i32) -> (i32, i32) {
    %c0_i32 = arith.constant 0 : i32
    return %arg0, %arg1 : i32, i32
  }
}

module attributes {stable_mosaic.version = 11 : i64} {
  func.func @_matmul_kernel(%arg0: i32, %arg1: i32, %arg2: i32, %arg3: memref<16x32xbf16, #tpu.memory_space<vmem>>, %arg4: memref<32x64xbf16, #tpu.memory_space<vmem>>, %arg5: memref<1x64xf32, #tpu.memory_space<vmem>>, %arg6: memref<16x64xbf16, #tpu.memory_space<vmem>>, %arg7: memref<16x64xf32, #tpu.memory_space<vmem>>) attributes {dimension_semantics = [#tpu.dimension_semantics<parallel>, #tpu.dimension_semantics<parallel>, #tpu.dimension_semantics<arbitrary>], iteration_bounds = array<i64: 1, 1, 1>, scalar_prefetch = 0 : i64, scratch_operands = 1 : i64, tpu.core_type = #tpu.core_type<tc>, window_params = [{transform_indices = @transform_0, window_bounds = array<i64: 16, 32>}, {transform_indices = @transform_1, window_bounds = array<i64: 32, 64>}, {transform_indices = @transform_2, window_bounds = array<i64: 1, 64>}, {transform_indices = @transform_3, window_bounds = array<i64: 16, 64>}]} {
    %c0_i32 = arith.constant 0 : i32
    %0 = arith.cmpi eq, %arg2, %c0_i32 : i32
    %1 = arith.extui %0 : i1 to i32
    %c0_i32_0 = arith.constant 0 : i32
    %2 = arith.cmpi ne, %1, %c0_i32_0 : i32
    scf.if %2 {
      %cst_10 = arith.constant 0.000000e+00 : f32
      %12 = vector.broadcast %cst_10 : f32 to vector<16x64xf32>
      %c0_11 = arith.constant 0 : index
      %c0_12 = arith.constant 0 : index
      %13 = vector.load %arg7[%c0_11, %c0_12] : memref<16x64xf32, #tpu.memory_space<vmem>>, vector<16x64xf32>
      tpu.vector_store %arg7[%c0_11, %c0_12], %12 {strides = array<i32>} : memref<16x64xf32, #tpu.memory_space<vmem>>, vector<16x64xf32>,
    } else {
    }
    %c0 = arith.constant 0 : index
    %c0_1 = arith.constant 0 : index
    %3 = vector.load %arg7[%c0, %c0_1] : memref<16x64xf32, #tpu.memory_space<vmem>>, vector<16x64xf32>
    %c0_2 = arith.constant 0 : index
    %c0_3 = arith.constant 0 : index
    %4 = vector.load %arg3[%c0_2, %c0_3] : memref<16x32xbf16, #tpu.memory_space<vmem>>, vector<16x32xbf16>
    %c0_4 = arith.constant 0 : index
    %c0_5 = arith.constant 0 : index
    %5 = vector.load %arg4[%c0_4, %c0_5] : memref<32x64xbf16, #tpu.memory_space<vmem>>, vector<32x64xbf16>
    %cst = arith.constant dense<0.000000e+00> : vector<16x64xf32>
    %6 = tpu.matmul %4, %5, %cst {dimension_numbers = #tpu.dot_dimension_numbers<[1], [0], [0], [1], [0, 0, 1, 1], [], []>} : vector<16x32xbf16>, vector<32x64xbf16>, vector<16x64xf32> -> vector<16x64xf32>
    %7 = arith.addf %3, %6 : vector<16x64xf32>
    %c0_6 = arith.constant 0 : index
    %c0_7 = arith.constant 0 : index
    %8 = vector.load %arg7[%c0_6, %c0_7] : memref<16x64xf32, #tpu.memory_space<vmem>>, vector<16x64xf32>
    tpu.vector_store %arg7[%c0_6, %c0_7], %7 {strides = array<i32>} : memref<16x64xf32, #tpu.memory_space<vmem>>, vector<16x64xf32>,
    %c0_i32_8 = arith.constant 0 : i32
    %9 = arith.cmpi eq, %arg2, %c0_i32_8 : i32
    %10 = arith.extui %9 : i1 to i32
    %c0_i32_9 = arith.constant 0 : i32
    %11 = arith.cmpi ne, %10, %c0_i32_9 : i32
    scf.if %11 {
      %c0_10 = arith.constant 0 : index
      %c0_11 = arith.constant 0 : index
      %12 = vector.load %arg7[%c0_10, %c0_11] : memref<16x64xf32, #tpu.memory_space<vmem>>, vector<16x64xf32>
      %c0_12 = arith.constant 0 : index
      %c0_13 = arith.constant 0 : index
      %13 = vector.load %arg5[%c0_12, %c0_13] : memref<1x64xf32, #tpu.memory_space<vmem>>, vector<1x64xf32>
      %14 = vector.broadcast %13 : vector<1x64xf32> to vector<16x64xf32>
      %15 = arith.addf %12, %14 : vector<16x64xf32>
      %cst_14 = arith.constant 0.000000e+00 : f32
      %16 = vector.broadcast %cst_14 : f32 to vector<16x64xf32>
      %17 = arith.maximumf %15, %16 : vector<16x64xf32>
      %18 = arith.truncf %17 : vector<16x64xf32> to vector<16x64xbf16>
      %c0_15 = arith.constant 0 : index
      %c0_16 = arith.constant 0 : index
      %19 = vector.load %arg6[%c0_15, %c0_16] : memref<16x64xbf16, #tpu.memory_space<vmem>>, vector<16x64xbf16>
      tpu.vector_store %arg6[%c0_15, %c0_16], %18 {strides = array<i32>} : memref<16x64xbf16, #tpu.memory_space<vmem>>, vector<16x64xbf16>,
    } else {
    }
    return
  }
  func.func @transform_0(%arg0: i32, %arg1: i32, %arg2: i32) -> (i32, i32) {
    %c0_i32 = arith.constant 0 : i32
    return %arg0, %arg2 : i32, i32
  }
  func.func @transform_1(%arg0: i32, %arg1: i32, %arg2: i32) -> (i32, i32) {
    %c0_i32 = arith.constant 0 : i32
    return %arg2, %arg1 : i32, i32
  }
  func.func @transform_2(%arg0: i32, %arg1: i32, %arg2: i32) -> (i32, i32) {
    %c0_i32 = arith.constant 0 : i32
    %c0_i32_0 = arith.constant 0 : i32
    return %c0_i32, %arg1 : i32, i32
  }
  func.func @transform_3(%arg0: i32, %arg1: i32, %arg2: i32) -> (i32, i32) {
    %c0_i32 = arith.constant 0 : i32
    return %arg0, %arg1 : i32, i32
  }
}

module attributes {stable_mosaic.version = 11 : i64} {
  func.func @kernel(%arg0: i32, %arg1: i32, %arg2: memref<1x1x8x8xbf16, #tpu.memory_space<vmem>>, %arg3: memref<1x1x16x8xbf16, #tpu.memory_space<vmem>>, %arg4: memref<1x1x16x8xbf16, #tpu.memory_space<vmem>>, %arg5: memref<1x1x8x8xbf16, #tpu.memory_space<vmem>>, %arg6: memref<1x1x8x16xbf16, #tpu.memory_space<vmem>>) attributes {dimension_semantics = [#tpu.dimension_semantics<parallel>, #tpu.dimension_semantics<parallel>], iteration_bounds = array<i64: 2, 4>, scalar_prefetch = 0 : i64, scratch_operands = 0 : i64, tpu.core_type = #tpu.core_type<tc>, window_params = [{transform_indices = @transform_0, window_bounds = array<i64: 1, 1, 8, 8>}, {transform_indices = @transform_1, window_bounds = array<i64: 1, 1, 16, 8>}, {transform_indices = @transform_2, window_bounds = array<i64: 1, 1, 16, 8>}, {transform_indices = @transform_3, window_bounds = array<i64: 1, 1, 8, 8>}, {transform_indices = @transform_4, window_bounds = array<i64: 1, 1, 8, 16>}]} {
    %c0 = arith.constant 0 : index
    %c0_0 = arith.constant 0 : index
    %c0_1 = arith.constant 0 : index
    %c0_2 = arith.constant 0 : index
    %0 = vector.load %arg2[%c0, %c0_0, %c0_1, %c0_2] : memref<1x1x8x8xbf16, #tpu.memory_space<vmem>>, vector<1x1x8x8xbf16>
    %1 = vector.shape_cast %0 : vector<1x1x8x8xbf16> to vector<8x8xbf16>
    %c0_3 = arith.constant 0 : index
    %c0_4 = arith.constant 0 : index
    %c0_5 = arith.constant 0 : index
    %c0_6 = arith.constant 0 : index
    %2 = vector.load %arg3[%c0_3, %c0_4, %c0_5, %c0_6] : memref<1x1x16x8xbf16, #tpu.memory_space<vmem>>, vector<1x1x16x8xbf16>
    %3 = vector.shape_cast %2 : vector<1x1x16x8xbf16> to vector<16x8xbf16>
    %c0_7 = arith.constant 0 : index
    %c0_8 = arith.constant 0 : index
    %c0_9 = arith.constant 0 : index
    %c0_10 = arith.constant 0 : index
    %4 = vector.load %arg4[%c0_7, %c0_8, %c0_9, %c0_10] : memref<1x1x16x8xbf16, #tpu.memory_space<vmem>>, vector<1x1x16x8xbf16>
    %5 = vector.shape_cast %4 : vector<1x1x16x8xbf16> to vector<16x8xbf16>
    %cst = arith.constant dense<0.000000e+00> : vector<8x16xf32>
    %6 = tpu.matmul %1, %3, %cst {dimension_numbers = #tpu.dot_dimension_numbers<[1], [1], [0], [0], [0, 0, 1, 0], [], []>} : vector<8x8xbf16>, vector<16x8xbf16>, vector<8x16xf32> -> vector<8x16xf32>
    %cst_11 = arith.constant 0.353553385 : f32
    %7 = vector.broadcast %cst_11 : f32 to vector<8x16xf32>
    %8 = arith.mulf %6, %7 : vector<8x16xf32>
    %cst_12 = arith.constant dense<0xFF800000> : vector<8xf32>
    %9 = vector.multi_reduction <maximumf>, %8, %cst_12 [1] : vector<8x16xf32> to vector<8xf32>
    %10 = vector.shape_cast %9 : vector<8xf32> to vector<8x1xf32>
    %11 = vector.broadcast %10 : vector<8x1xf32> to vector<8x16xf32>
    %12 = arith.subf %8, %11 : vector<8x16xf32>
    %13 = math.exp %12 : vector<8x16xf32>
    %cst_13 = arith.constant dense<0.000000e+00> : vector<8xf32>
    %14 = vector.multi_reduction <add>, %13, %cst_13 [1] : vector<8x16xf32> to vector<8xf32>
    %15 = vector.shape_cast %14 : vector<8xf32> to vector<8x1xf32>
    %16 = tpu.reciprocal %15 {approx = true} : vector<8x1xf32> -> vector<8x1xf32>
    %17 = vector.broadcast %16 : vector<8x1xf32> to vector<8x16xf32>
    %18 = arith.mulf %13, %17 : vector<8x16xf32>
    %19 = arith.truncf %18 : vector<8x16xf32> to vector<8x16xbf16>
    %20 = vector.shape_cast %19 : vector<8x16xbf16> to vector<1x1x8x16xbf16>
    %c0_14 = arith.constant 0 : index
    %c0_15 = arith.constant 0 : index
    %c0_16 = arith.constant 0 : index
    %c0_17 = arith.constant 0 : index
    %21 = vector.load %arg6[%c0_14, %c0_15, %c0_16, %c0_17] : memref<1x1x8x16xbf16, #tpu.memory_space<vmem>>, vector<1x1x8x16xbf16>
    tpu.vector_store %arg6[%c0_14, %c0_15, %c0_16, %c0_17], %20 {strides = array<i32>} : memref<1x1x8x16xbf16, #tpu.memory_space<vmem>>, vector<1x1x8x16xbf16>,
    %22 = arith.truncf %18 : vector<8x16xf32> to vector<8x16xbf16>
    %cst_18 = arith.constant dense<0.000000e+00> : vector<8x8xf32>
    %23 = tpu.matmul %22, %5, %cst_18 {dimension_numbers = #tpu.dot_dimension_numbers<[1], [0], [0], [1], [0, 0, 1, 1], [], []>} : vector<8x16xbf16>, vector<16x8xbf16>, vector<8x8xf32> -> vector<8x8xf32>
    %24 = arith.truncf %23 : vector<8x8xf32> to vector<8x8xbf16>
    %25 = vector.shape_cast %24 : vector<8x8xbf16> to vector<1x1x8x8xbf16>
    %c0_19 = arith.constant 0 : index
    %c0_20 = arith.constant 0 : index
    %c0_21 = arith.constant 0 : index
    %c0_22 = arith.constant 0 : index
    %26 = vector.load %arg5[%c0_19, %c0_20, %c0_21, %c0_22] : memref<1x1x8x8xbf16, #tpu.memory_space<vmem>>, vector<1x1x8x8xbf16>
    tpu.vector_store %arg5[%c0_19, %c0_20, %c0_21, %c0_22], %25 {strides = array<i32>} : memref<1x1x8x8xbf16, #tpu.memory_space<vmem>>, vector<1x1x8x8xbf16>,
    return
  }
  func.func @transform_0(%arg0: i32, %arg1: i32) -> (i32, i32, i32, i32) {
    %c0_i32 = arith.constant 0 : i32
    %c0_i32_0 = arith.constant 0 : i32
    %c0_i32_1 = arith.constant 0 : i32
    return %arg0, %arg1, %c0_i32, %c0_i32_0 : i32, i32, i32, i32
  }
  func.func @transform_1(%arg0: i32, %arg1: i32) -> (i32, i32, i32, i32) {
    %c0_i32 = arith.constant 0 : i32
    %c0_i32_0 = arith.constant 0 : i32
    %c0_i32_1 = arith.constant 0 : i32
    return %arg0, %arg1, %c0_i32, %c0_i32_0 : i32, i32, i32, i32
  }
  func.func @transform_2(%arg0: i32, %arg1: i32) -> (i32, i32, i32, i32) {
    %c0_i32 = arith.constant 0 : i32
    %c0_i32_0 = arith.constant 0 : i32
    %c0_i32_1 = arith.constant 0 : i32
    return %arg0, %arg1, %c0_i32, %c0_i32_0 : i32, i32, i32, i32
  }
  func.func @transform_3(%arg0: i32, %arg1: i32) -> (i32, i32, i32, i32) {
    %c0_i32 = arith.constant 0 : i32
    %c0_i32_0 = arith.constant 0 : i32
    %c0_i32_1 = arith.constant 0 : i32
    return %arg0, %arg1, %c0_i32, %c0_i32_0 : i32, i32, i32, i32
  }
  func.func @transform_4(%arg0: i32, %arg1: i32) -> (i32, i32, i32, i32) {
    %c0_i32 = arith.constant 0 : i32
    %c0_i32_0 = arith.constant 0 : i32
    %c0_i32_1 = arith.constant 0 : i32
    return %arg0, %arg1, %c0_i32, %c0_i32_0 : i32, i32, i32, i32
  }
}

module attributes {stable_mosaic.version = 11 : i64} {
  func.func @_linear_res_ln_kernel(%arg0: i32, %arg1: i32, %arg2: memref<16x64xbf16, #tpu.memory_space<vmem>>, %arg3: memref<64x32xbf16, #tpu.memory_space<vmem>>, %arg4: memref<1x32xf32, #tpu.memory_space<vmem>>, %arg5: memref<16x32xbf16, #tpu.memory_space<vmem>>, %arg6: memref<1x32xf32, #tpu.memory_space<vmem>>, %arg7: memref<1x32xf32, #tpu.memory_space<vmem>>, %arg8: memref<16x32xbf16, #tpu.memory_space<vmem>>, %arg9: memref<16x32xf32, #tpu.memory_space<vmem>>) attributes {dimension_semantics = [#tpu.dimension_semantics<parallel>, #tpu.dimension_semantics<arbitrary>], iteration_bounds = array<i64: 1, 1>, scalar_prefetch = 0 : i64, scratch_operands = 1 : i64, tpu.core_type = #tpu.core_type<tc>, window_params = [{transform_indices = @transform_0, window_bounds = array<i64: 16, 64>}, {transform_indices = @transform_1, window_bounds = array<i64: 64, 32>}, {pipeline_mode = #tpu.pipeline_mode<synchronous>, transform_indices = @transform_2, window_bounds = array<i64: 1, 32>}, {transform_indices = @transform_3, window_bounds = array<i64: 16, 32>}, {pipeline_mode = #tpu.pipeline_mode<synchronous>, transform_indices = @transform_4, window_bounds = array<i64: 1, 32>}, {pipeline_mode = #tpu.pipeline_mode<synchronous>, transform_indices = @transform_5, window_bounds = array<i64: 1, 32>}, {transform_indices = @transform_6, window_bounds = array<i64: 16, 32>}]} {
    %c0_i32 = arith.constant 0 : i32
    %0 = arith.cmpi eq, %arg1, %c0_i32 : i32
    %1 = arith.extui %0 : i1 to i32
    %c0_i32_0 = arith.constant 0 : i32
    %2 = arith.cmpi ne, %1, %c0_i32_0 : i32
    scf.if %2 {
      %cst_10 = arith.constant 0.000000e+00 : f32
      %12 = vector.broadcast %cst_10 : f32 to vector<16x32xf32>
      %c0_11 = arith.constant 0 : index
      %c0_12 = arith.constant 0 : index
      %13 = vector.load %arg9[%c0_11, %c0_12] : memref<16x32xf32, #tpu.memory_space<vmem>>, vector<16x32xf32>
      tpu.vector_store %arg9[%c0_11, %c0_12], %12 {strides = array<i32>} : memref<16x32xf32, #tpu.memory_space<vmem>>, vector<16x32xf32>,
    } else {
    }
    %c0 = arith.constant 0 : index
    %c0_1 = arith.constant 0 : index
    %3 = vector.load %arg9[%c0, %c0_1] : memref<16x32xf32, #tpu.memory_space<vmem>>, vector<16x32xf32>
    %c0_2 = arith.constant 0 : index
    %c0_3 = arith.constant 0 : index
    %4 = vector.load %arg2[%c0_2, %c0_3] : memref<16x64xbf16, #tpu.memory_space<vmem>>, vector<16x64xbf16>
    %c0_4 = arith.constant 0 : index
    %c0_5 = arith.constant 0 : index
    %5 = vector.load %arg3[%c0_4, %c0_5] : memref<64x32xbf16, #tpu.memory_space<vmem>>, vector<64x32xbf16>
    %cst = arith.constant dense<0.000000e+00> : vector<16x32xf32>
    %6 = tpu.matmul %4, %5, %cst {dimension_numbers = #tpu.dot_dimension_numbers<[1], [0], [0], [1], [0, 0, 1, 1], [], []>} : vector<16x64xbf16>, vector<64x32xbf16>, vector<16x32xf32> -> vector<16x32xf32>
    %7 = arith.addf %3, %6 : vector<16x32xf32>
    %c0_6 = arith.constant 0 : index
    %c0_7 = arith.constant 0 : index
    %8 = vector.load %arg9[%c0_6, %c0_7] : memref<16x32xf32, #tpu.memory_space<vmem>>, vector<16x32xf32>
    tpu.vector_store %arg9[%c0_6, %c0_7], %7 {strides = array<i32>} : memref<16x32xf32, #tpu.memory_space<vmem>>, vector<16x32xf32>,
    %c0_i32_8 = arith.constant 0 : i32
    %9 = arith.cmpi eq, %arg1, %c0_i32_8 : i32
    %10 = arith.extui %9 : i1 to i32
    %c0_i32_9 = arith.constant 0 : i32
    %11 = arith.cmpi ne, %10, %c0_i32_9 : i32
    scf.if %11 {
      %c0_10 = arith.constant 0 : index
      %c0_11 = arith.constant 0 : index
      %12 = vector.load %arg9[%c0_10, %c0_11] : memref<16x32xf32, #tpu.memory_space<vmem>>, vector<16x32xf32>
      %c0_12 = arith.constant 0 : index
      %c0_13 = arith.constant 0 : index
      %13 = vector.load %arg4[%c0_12, %c0_13] : memref<1x32xf32, #tpu.memory_space<vmem>>, vector<1x32xf32>
      %14 = vector.broadcast %13 : vector<1x32xf32> to vector<16x32xf32>
      %15 = arith.addf %12, %14 : vector<16x32xf32>
      %c0_14 = arith.constant 0 : index
      %c0_15 = arith.constant 0 : index
      %16 = vector.load %arg5[%c0_14, %c0_15] : memref<16x32xbf16, #tpu.memory_space<vmem>>, vector<16x32xbf16>
      %17 = arith.extf %16 : vector<16x32xbf16> to vector<16x32xf32>
      %18 = arith.addf %15, %17 : vector<16x32xf32>
      %cst_16 = arith.constant dense<0.000000e+00> : vector<16xf32>
      %19 = vector.multi_reduction <add>, %18, %cst_16 [1] : vector<16x32xf32> to vector<16xf32>
      %20 = vector.shape_cast %19 : vector<16xf32> to vector<16x1xf32>
      %cst_17 = arith.constant 3.200000e+01 : f32
      %21 = vector.broadcast %cst_17 : f32 to vector<16x1xf32>
      %22 = arith.divf %20, %21 : vector<16x1xf32>
      %23 = vector.broadcast %22 : vector<16x1xf32> to vector<16x32xf32>
      %24 = arith.subf %18, %23 : vector<16x32xf32>
      %25 = arith.mulf %24, %24 : vector<16x32xf32>
      %cst_18 = arith.constant dense<0.000000e+00> : vector<16xf32>
      %26 = vector.multi_reduction <add>, %25, %cst_18 [1] : vector<16x32xf32> to vector<16xf32>
      %27 = vector.shape_cast %26 : vector<16xf32> to vector<16x1xf32>
      %cst_19 = arith.constant 3.200000e+01 : f32
      %28 = vector.broadcast %cst_19 : f32 to vector<16x1xf32>
      %29 = arith.divf %27, %28 : vector<16x1xf32>
      %cst_20 = arith.constant 9.99999974E-6 : f32
      %30 = vector.broadcast %cst_20 : f32 to vector<16x1xf32>
      %31 = arith.addf %29, %30 : vector<16x1xf32>
      %32 = math.rsqrt %31 : vector<16x1xf32>
      %33 = vector.broadcast %32 : vector<16x1xf32> to vector<16x32xf32>
      %34 = arith.mulf %24, %33 : vector<16x32xf32>
      %c0_21 = arith.constant 0 : index
      %c0_22 = arith.constant 0 : index
      %35 = vector.load %arg6[%c0_21, %c0_22] : memref<1x32xf32, #tpu.memory_space<vmem>>, vector<1x32xf32>
      %36 = vector.broadcast %35 : vector<1x32xf32> to vector<16x32xf32>
      %37 = arith.mulf %34, %36 : vector<16x32xf32>
      %c0_23 = arith.constant 0 : index
      %c0_24 = arith.constant 0 : index
      %38 = vector.load %arg7[%c0_23, %c0_24] : memref<1x32xf32, #tpu.memory_space<vmem>>, vector<1x32xf32>
      %39 = vector.broadcast %38 : vector<1x32xf32> to vector<16x32xf32>
      %40 = arith.addf %37, %39 : vector<16x32xf32>
      %41 = arith.truncf %40 : vector<16x32xf32> to vector<16x32xbf16>
      %c0_25 = arith.constant 0 : index
      %c0_26 = arith.constant 0 : index
      %42 = vector.load %arg8[%c0_25, %c0_26] : memref<16x32xbf16, #tpu.memory_space<vmem>>, vector<16x32xbf16>
      tpu.vector_store %arg8[%c0_25, %c0_26], %41 {strides = array<i32>} : memref<16x32xbf16, #tpu.memory_space<vmem>>, vector<16x32xbf16>,
    } else {
    }
    return
  }
  func.func @transform_0(%arg0: i32, %arg1: i32) -> (i32, i32) {
    %c0_i32 = arith.constant 0 : i32
    return %arg0, %arg1 : i32, i32
  }
  func.func @transform_1(%arg0: i32, %arg1: i32) -> (i32, i32) {
    %c0_i32 = arith.constant 0 : i32
    %c0_i32_0 = arith.constant 0 : i32
    return %arg1, %c0_i32 : i32, i32
  }
  func.func @transform_2(%arg0: i32, %arg1: i32) -> (i32, i32) {
    %c0_i32 = arith.constant 0 : i32
    %c0_i32_0 = arith.constant 0 : i32
    %c0_i32_1 = arith.constant 0 : i32
    return %c0_i32, %c0_i32_0 : i32, i32
  }
  func.func @transform_3(%arg0: i32, %arg1: i32) -> (i32, i32) {
    %c0_i32 = arith.constant 0 : i32
    %c0_i32_0 = arith.constant 0 : i32
    return %arg0, %c0_i32 : i32, i32
  }
  func.func @transform_4(%arg0: i32, %arg1: i32) -> (i32, i32) {
    %c0_i32 = arith.constant 0 : i32
    %c0_i32_0 = arith.constant 0 : i32
    %c0_i32_1 = arith.constant 0 : i32
    return %c0_i32, %c0_i32_0 : i32, i32
  }
  func.func @transform_5(%arg0: i32, %arg1: i32) -> (i32, i32) {
    %c0_i32 = arith.constant 0 : i32
    %c0_i32_0 = arith.constant 0 : i32
    %c0_i32_1 = arith.constant 0 : i32
    return %c0_i32, %c0_i32_0 : i32, i32
  }
  func.func @transform_6(%arg0: i32, %arg1: i32) -> (i32, i32) {
    %c0_i32 = arith.constant 0 : i32
    %c0_i32_0 = arith.constant 0 : i32
    return %arg0, %c0_i32 : i32, i32
  }
}

module attributes {stable_mosaic.version = 11 : i64} {
  func.func @_matmul_kernel(%arg0: i32, %arg1: i32, %arg2: i32, %arg3: memref<16x32xbf16, #tpu.memory_space<vmem>>, %arg4: memref<32x50xbf16, #tpu.memory_space<vmem>>, %arg5: memref<1x50xf32, #tpu.memory_space<vmem>>, %arg6: memref<16x50xf32, #tpu.memory_space<vmem>>, %arg7: memref<16x50xf32, #tpu.memory_space<vmem>>) attributes {dimension_semantics = [#tpu.dimension_semantics<parallel>, #tpu.dimension_semantics<parallel>, #tpu.dimension_semantics<arbitrary>], iteration_bounds = array<i64: 1, 1, 1>, scalar_prefetch = 0 : i64, scratch_operands = 1 : i64, tpu.core_type = #tpu.core_type<tc>, window_params = [{transform_indices = @transform_0, window_bounds = array<i64: 16, 32>}, {transform_indices = @transform_1, window_bounds = array<i64: 32, 50>}, {transform_indices = @transform_2, window_bounds = array<i64: 1, 50>}, {transform_indices = @transform_3, window_bounds = array<i64: 16, 50>}]} {
    %c0_i32 = arith.constant 0 : i32
    %0 = arith.cmpi eq, %arg2, %c0_i32 : i32
    %1 = arith.extui %0 : i1 to i32
    %c0_i32_0 = arith.constant 0 : i32
    %2 = arith.cmpi ne, %1, %c0_i32_0 : i32
    scf.if %2 {
      %cst_10 = arith.constant 0.000000e+00 : f32
      %12 = vector.broadcast %cst_10 : f32 to vector<16x50xf32>
      %c0_11 = arith.constant 0 : index
      %c0_12 = arith.constant 0 : index
      %13 = vector.load %arg7[%c0_11, %c0_12] : memref<16x50xf32, #tpu.memory_space<vmem>>, vector<16x50xf32>
      tpu.vector_store %arg7[%c0_11, %c0_12], %12 {strides = array<i32>} : memref<16x50xf32, #tpu.memory_space<vmem>>, vector<16x50xf32>,
    } else {
    }
    %c0 = arith.constant 0 : index
    %c0_1 = arith.constant 0 : index
    %3 = vector.load %arg7[%c0, %c0_1] : memref<16x50xf32, #tpu.memory_space<vmem>>, vector<16x50xf32>
    %c0_2 = arith.constant 0 : index
    %c0_3 = arith.constant 0 : index
    %4 = vector.load %arg3[%c0_2, %c0_3] : memref<16x32xbf16, #tpu.memory_space<vmem>>, vector<16x32xbf16>
    %c0_4 = arith.constant 0 : index
    %c0_5 = arith.constant 0 : index
    %5 = vector.load %arg4[%c0_4, %c0_5] : memref<32x50xbf16, #tpu.memory_space<vmem>>, vector<32x50xbf16>
    %cst = arith.constant dense<0.000000e+00> : vector<16x50xf32>
    %6 = tpu.matmul %4, %5, %cst {dimension_numbers = #tpu.dot_dimension_numbers<[1], [0], [0], [1], [0, 0, 1, 1], [], []>} : vector<16x32xbf16>, vector<32x50xbf16>, vector<16x50xf32> -> vector<16x50xf32>
    %7 = arith.addf %3, %6 : vector<16x50xf32>
    %c0_6 = arith.constant 0 : index
    %c0_7 = arith.constant 0 : index
    %8 = vector.load %arg7[%c0_6, %c0_7] : memref<16x50xf32, #tpu.memory_space<vmem>>, vector<16x50xf32>
    tpu.vector_store %arg7[%c0_6, %c0_7], %7 {strides = array<i32>} : memref<16x50xf32, #tpu.memory_space<vmem>>, vector<16x50xf32>,
    %c0_i32_8 = arith.constant 0 : i32
    %9 = arith.cmpi eq, %arg2, %c0_i32_8 : i32
    %10 = arith.extui %9 : i1 to i32
    %c0_i32_9 = arith.constant 0 : i32
    %11 = arith.cmpi ne, %10, %c0_i32_9 : i32
    scf.if %11 {
      %c0_10 = arith.constant 0 : index
      %c0_11 = arith.constant 0 : index
      %12 = vector.load %arg7[%c0_10, %c0_11] : memref<16x50xf32, #tpu.memory_space<vmem>>, vector<16x50xf32>
      %c0_12 = arith.constant 0 : index
      %c0_13 = arith.constant 0 : index
      %13 = vector.load %arg5[%c0_12, %c0_13] : memref<1x50xf32, #tpu.memory_space<vmem>>, vector<1x50xf32>
      %14 = vector.broadcast %13 : vector<1x50xf32> to vector<16x50xf32>
      %15 = arith.addf %12, %14 : vector<16x50xf32>
      %c0_14 = arith.constant 0 : index
      %c0_15 = arith.constant 0 : index
      %16 = vector.load %arg6[%c0_14, %c0_15] : memref<16x50xf32, #tpu.memory_space<vmem>>, vector<16x50xf32>
      tpu.vector_store %arg6[%c0_14, %c0_15], %15 {strides = array<i32>} : memref<16x50xf32, #tpu.memory_space<vmem>>, vector<16x50xf32>,
    } else {
    }
    return
  }
  func.func @transform_0(%arg0: i32, %arg1: i32, %arg2: i32) -> (i32, i32) {
    %c0_i32 = arith.constant 0 : i32
    return %arg0, %arg2 : i32, i32
  }
  func.func @transform_1(%arg0: i32, %arg1: i32, %arg2: i32) -> (i32, i32) {
    %c0_i32 = arith.constant 0 : i32
    return %arg2, %arg1 : i32, i32
  }
  func.func @transform_2(%arg0: i32, %arg1: i32, %arg2: i32) -> (i32, i32) {
    %c0_i32 = arith.constant 0 : i32
    %c0_i32_0 = arith.constant 0 : i32
    return %c0_i32, %arg1 : i32, i32
  }
  func.func @transform_3(%arg0: i32, %arg1: i32, %arg2: i32) -> (i32, i32) {
    %c0_i32 = arith.constant 0 : i32
    return %arg0, %arg1 : i32, i32
  }
}

</mosaic_0001>

<bundles_post_ra>
// kernel: transformer_forward.22
= control target key start
LH: loop header
LB: loop body
LE: loop exit
PB: predicated region body
PF: predicated region fallthrough
CT: control target
= control target key end

     0   :  { %s711_s15 = smov 0   ;;  %s713_s16 = smov 0   ;;  %s782_s0 = inlined_call_operand.vmem [shape: bf16[2,4,8,8], index: 0, kind: input, shape index: {}]   ;;  %s783_s1 = inlined_call_operand.vmem [shape: bf16[2,4,8,8], index: 1, kind: input, shape index: {}]   ;;  %s784_s2 = inlined_call_operand.vmem [shape: bf16[2,4,8,8], index: 2, kind: input, shape index: {}]   ;;  %s785_s3 = inlined_call_operand.vmem [shape: f32[2,1,8], index: 3, kind: input, shape index: {}]   ;;  %s786_s4 = inlined_call_operand.vmem [shape: bf16[2,4,8,8], index: 4, kind: output, shape index: {}]  }
   0x1   :  { %s715_s17 = smov 0   ;;  %s717_s18 = smov 0  }
   0x2   :  { %s719_s19 = smov 0  }
   0x3 LB: > { %s23_s20 = sadd.s32 1, %s674_s17  ;;  %s26_s21 = sadd.s32 1, %s678_s18  ;;  %s682_s19 = sphi %s719_s19, %s14_s19   ;;  %s678_s18 = sphi %s717_s18, %s790_s18   ;;  %s674_s17 = sphi %s715_s17, %s789_s17   ;;  %s670_s16 = sphi %s713_s16, %s788_s16   ;;  %s666_s15 = sphi %s711_s15, %s787_s15  }
   0x4   : > { %p24_p0 = scmp.ge.s32.totalorder %s23_s20, 4  ;;  %p568_p1 = scmp.ge.s32.totalorder %s682_s19, 1 }
   0x5   : > { %p219_p2 = scmp.lt.s32.totalorder %s682_s19, 9 }
   0x6   : > { %s792_s20 = smov (%p24_p0, %s23_s20), 0  ;;  %s794_s21 = smov (!%p24_p0, %s26_s21), %s678_s18 }
   0x7   : > { %p220_p3 = pnand %p568_p1, %p219_p2  ;;  %p28_p4 = scmp.ge.s32.totalorder %s794_s21, 2 }
   0x8   : > { %p270_p5 = scmp.lt.s32.totalorder (!%p220_p3), %s670_s16, 1  ;;  %p272_p6 = scmp.lt.s32.totalorder (!%p220_p3), %s666_s15, 3  ;;  %v684_v0 = vmov (!%p220_p3), 0.0   ;;  %vm685_vm0 = vmmov (!%p220_p3), 0   ;;  %vm309_vm1 = vcmask (!%p220_p3), 64512   ;;  %v357_v4 = vlaneseq (!%p220_p3) }
   0x9   : > { %s796_s21 = smov (%p28_p4, %s794_s21), 0  ;;  %223 = sbr.rel (%p220_p3) target bundleno = 778 (0x30a), region = 36 }
   0xa   : > { %586 = vmatprep.subr.bf16.mxu0 (!%p220_p3), %v684_v0  ;;  %588 = vmatprep.mubr.msk.bf16.mxu0 (!%p220_p3), %vm685_vm0, %v684_v0  ;;  %v358_v5 = vshrl.u32 (!%p220_p3), %v357_v4, 7  ;;  %v360_v6 = vand.u32 (!%p220_p3), 127, %v357_v4  ;;  %vm386_vm3 = vcmask (!%p220_p3), 1043456   ;;  %vm431_vm4 = vcmask (!%p220_p3), 60416  }
   0xb   : > { %592 = vmatprep.subr.bf16.mxu1 (!%p220_p3), %v684_v0  ;;  %594 = vmatprep.mubr.msk.bf16.mxu1 (!%p220_p3), %vm685_vm0, %v684_v0 }
   0xc   : > { %vm361_vm2 = vcmp.gt.s32.totalorder (!%p220_p3), %v360_v6, %v358_v5 }
  0x10   : > { %s798_s16 = smov (!%p270_p5, %s670_s16), 1  ;;  %s800_s15 = smov (!%p272_p6, %s666_s15), 3 }
  0x11   : > { %s569_s22 = sshll.u32 %s798_s16, 2  ;;  %s296_s7 = scalar_lea.vmem %s785_s3, %s798_s16 }
  0x12   : > { %s275_s23 = sadd.s32 %s569_s22, %s800_s15  ;;  %v578_v10 = vld [vmem:[%s296_s7] ss:$0 sm:$0xff] }
  0x13   : > { %s741_s24 = sshll.u32 %s275_s23, 2 }
  0x14   : > { %s285_s27 = scalar_lea.vmem %s783_s1, %s741_s24  ;;  %s277_s30 = scalar_lea.vmem %s782_s0, %s741_s24 }
  0x15   : > { %v307_v1 = vld [vmem:[%s285_s27] sm:$0xf]  ;;  %s293_s10 = scalar_lea.vmem %s784_s2, %s741_s24  ;;  %s304_s13 = scalar_lea.vmem %s786_s4, %s741_s24 }
  0x16   : > { %v314_v2 = vsel %vm309_vm1, %v307_v1, 0  ;;  %v306_v3 = vld [vmem:[%s277_s30] sm:$0xf] }
  0x17   : > { %587 = vmatpush3.bf16.xpose.msra.mxu0 %v314_v2  ;;  %v308_v21 = vld [vmem:[%s293_s10] sm:$0xf] }
  0x18   : > { %v388_v22 = vsel %vm386_vm3, %v308_v21, 0 }
  0x19   : > { %593 = vmatpush3.bf16.msra.mxu1 %v388_v22 }
  0x1e   : > { %589 = vmatmul.mubr.msk.bf16.vlgmr.msra.gmra.mrb[0].mxu0 %vm309_vm1, %v306_v3 }
  0xf1   : > { %v350_v7 = vpop.f32.mrb[0].mxu0 }
  0xf2   : > { %v356_v8 = vmul.f32 0.35355338, %v350_v7  ;;  %v590_v9 = vpop.f32.mrb[1].mxu0 }
  0xf3   : > { %v353_v11 = vpop.f32.mrb[2].mxu0 }
  0xf4   : > { %v362_v12 = vsel %vm361_vm2, -1e+30, %v356_v8  ;;  %v591_v13 = vpop.f32.mrb[3].mxu0 }
  0xf5   : > { %v370_v14 = vadd.f32 %v578_v10, %v362_v12 }
  0xf7   : > { %v371_v15 = vsel %vm309_vm1, %v370_v14, -inf }
  0xf8   : > { %372 = vmax.xlane.f32.xlu0 %v371_v15 }
 0x185   : > { %v373_v16 = vpop.xlane.xlu0 %372 }
 0x186   : > { %v374_v17 = vsub.f32 %v370_v14, %v373_v16 }
 0x188   : > { %v375_v18 = vmul.f32 1.442695, %v374_v17 }
 0x18a   : > { %640 = vpow2.f32 %v375_v18 }
 0x194   : > { %v641_v19 = vpop.eup %640 }
 0x195   : > { %v377_v20 = vsel %vm309_vm1, %v641_v19, 0.0 }
 0x196   : > { %378 = vadd.xlane.f32.xlu0 %v377_v20 }
 0x223   : > { %v379_v23 = vpop.xlane.xlu0 %378 }
 0x224   : > { %642 = vrcp.f32 %v379_v23 }
 0x22e   : > { %v643_v24 = vpop.eup %642 }
 0x22f   : > { %v381_v25 = vmul.f32 %v643_v24, %v641_v19 }
 0x231   : > { %v382_v26 = vpack.c.bf16 %v381_v25, %v381_v25 }
 0x233   : > { %595 = vmatmul.mubr.msk.bf16.vlgmr.msra.gmra.mrb[0].mxu1 %vm309_vm1, %v382_v26 }
 0x306   : > { %v424_v27 = vpop.f32.mrb[0].mxu1 }
 0x307   : > { %v430_v28 = vpack.c.bf16 %v424_v27, %v424_v27  ;;  %v596_v29 = vpop.f32.mrb[1].mxu1 }
 0x308   : > { %v427_v30 = vpop.f32.mrb[2].mxu1 }
 0x309   : > { %432 = vst.msk [vmem:[%s304_s13] sm:$0xf] %vm431_vm4, %v430_v28  ;;  %v597_v31 = vpop.f32.mrb[3].mxu1 }
 0x30a PF: > { %s14_s19 = sadd.s32 1, %s682_s19   ;;  %s787_s15 = smov %s674_s17 }
 0x30b   : > { %p11_p7 = scmp.ge.s32.totalorder %s14_s19, 10   ;;  %s788_s16 = smov %s678_s18 }
 0x30c   : > { %s789_s17 = smov %s792_s20  ;;  %s790_s18 = smov %s796_s21 }
 0x30d   :  { %13 = sbr.rel (!%p11_p7) target bundleno = 3 (0x3), region = 75 }

// kernel: transformer_forward.21
= control target key start
LH: loop header
LB: loop body
LE: loop exit
PB: predicated region body
PF: predicated region fallthrough
CT: control target
= control target key end

     0   :  { %vm19_vm0 = vcmask 785408   ;;  %v151_v0 = vmov 0.0   ;;  %vm152_vm1 = vmmov 0   ;;  %vm47_vm2 = vcmask 261120   ;;  %s195_s1 = inlined_call_operand.vmem [shape: bf16[32,96], index: 1, kind: input, shape index: {}]   ;;  %s196_s0 = inlined_call_operand.vmem [shape: bf16[16,32], index: 0, kind: input, shape index: {}]   ;;  %s197_s2 = inlined_call_operand.vmem [shape: f32[1,96], index: 2, kind: input, shape index: {}]   ;;  %s198_s3 = inlined_call_operand.vmem [shape: bf16[16,96], index: 3, kind: output, shape index: {}]  }
   0x1   :  { %138 = vmatprep.subr.bf16.mxu0 %v151_v0  ;;  %v148_v1 = vld [vmem:[%s195_s1] sm:$0xff]   ;;  %142 = vmatprep.mubr.msk.bf16.mxu0 %vm152_vm1, %v151_v0  ;;  %20 = vst.msk [vmem:[#allocation2] sm:$0xff] %vm19_vm0, %v151_v0  ;;  %21 = vst.msk [vmem:[#allocation2 + $0x8] sm:$0xff] %vm19_vm0, %v151_v0  ;;  %v149_v2 = vld [vmem:[%s195_s1 + $0x8] sm:$0xff]   ;;  %vm119_vm3 = vcmask 781312  }
   0x2   :  { %139 = vmatpush3.bf16.msra.mxu0 %v148_v1  ;;  %v150_v3 = vld [vmem:[%s196_s0] sm:$0xff]  }
   0x3   :  { %140 = vmatprep.subr.bf16.mxu0 %v151_v0  ;;  %v130_v12 = vld [vmem:[%s197_s2] ss:$0 sm:$0xff] }
   0x6   :  { %141 = vmatpush3.bf16.msra.mxu0 %v149_v2 }
   0x8   :  { %v22_v4 = vld [vmem:[#allocation2] sm:$0xff]  ;;  %v23_v6 = vld [vmem:[#allocation2 + $0x8] sm:$0xff] }
   0x9   :  { %143 = vmatmul.mubr.msk.bf16.vlgmr.msra.gmra.mrb[0].mxu0 %vm47_vm2, %v150_v3 }
  0xdc   :  { %v85_v5 = vpop.f32.mrb[0].mxu0 }
  0xdd   :  { %v92_v7 = vadd.f32 %v85_v5, %v22_v4  ;;  %v144_v8 = vpop.f32.mrb[1].mxu0 }
  0xde   :  { %v88_v9 = vpop.f32.mrb[2].mxu0 }
  0xdf   :  { %95 = vst.msk [vmem:[#allocation2] sm:$0xff] %vm19_vm0, %v92_v7  ;;  %v93_v10 = vadd.f32 %v88_v9, %v23_v6  ;;  %v145_v11 = vpop.f32.mrb[3].mxu0 }
  0xe1   :  { %96 = vst.msk [vmem:[#allocation2 + $0x8] sm:$0xff] %vm19_vm0, %v93_v10 }
  0xe6   :  { %v100_v13 = vld [vmem:[#allocation2] sm:$0xff] }
  0xe7   :  { %v109_v14 = vadd.f32 %v130_v12, %v100_v13 }
  0xe8   :  { %v101_v15 = vld [vmem:[#allocation2 + $0x8] sm:$0xff] }
  0xe9   :  { %v133_v16 = vpack.c.bf16 %v109_v14, %v109_v14  ;;  %v110_v17 = vadd.f32 %v130_v12, %v101_v15 }
  0xeb   :  { %120 = vst.msk [vmem:[%s198_s3] sm:$0xf] %vm119_vm3, %v133_v16  ;;  %v134_v18 = vpack.c.bf16 %v110_v17, %v110_v17 }
  0xed   :  { %121 = vst.msk [vmem:[%s198_s3 + $0x4] sm:$0xf] %vm119_vm3, %v134_v18 }

// kernel: transformer_forward.23
= control target key start
LH: loop header
LB: loop body
LE: loop exit
PB: predicated region body
PF: predicated region fallthrough
CT: control target
= control target key end

     0   :  { %vm28_vm0 = vcmask 261120   ;;  %v220_v0 = vmov 0.0   ;;  %vm221_vm1 = vmmov 0   ;;  %vm178_vm2 = vcmask 257024   ;;  %s293_s1 = inlined_call_operand.vmem [shape: bf16[32,32], index: 1, kind: input, shape index: {}]   ;;  %s294_s0 = inlined_call_operand.vmem [shape: bf16[16,32], index: 0, kind: input, shape index: {}]   ;;  %s295_s3 = inlined_call_operand.vmem [shape: bf16[16,32], index: 3, kind: input, shape index: {}]   ;;  %s296_s2 = inlined_call_operand.vmem [shape: f32[1,32], index: 2, kind: input, shape index: {}]   ;;  %s297_s4 = inlined_call_operand.vmem [shape: f32[1,32], index: 4, kind: input, shape index: {}]   ;;  %s298_s5 = inlined_call_operand.vmem [shape: f32[1,32], index: 5, kind: input, shape index: {}]   ;;  %s299_s6 = inlined_call_operand.vmem [shape: bf16[16,32], index: 6, kind: output, shape index: {}]  }
   0x1   :  { %203 = vmatprep.subr.bf16.mxu0 %v220_v0  ;;  %v213_v1 = vld [vmem:[%s293_s1] sm:$0xff]   ;;  %207 = vmatprep.mubr.msk.bf16.mxu0 %vm221_vm1, %v220_v0  ;;  %29 = vst.msk [vmem:[#allocation2] sm:$0xff] %vm28_vm0, %v220_v0  ;;  %30 = vst.msk [vmem:[#allocation2 + $0x8] sm:$0xff] %vm28_vm0, %v220_v0  ;;  %v214_v2 = vld [vmem:[%s293_s1 + $0x8] sm:$0xff]  }
   0x2   :  { %204 = vmatpush3.bf16.msra.mxu0 %v213_v1  ;;  %v215_v3 = vld [vmem:[%s294_s0] sm:$0xff]  }
   0x3   :  { %205 = vmatprep.subr.bf16.mxu0 %v220_v0  ;;  %v197_v12 = vld [vmem:[%s295_s3] sm:$0xff]  }
   0x4   :  { %v189_v13 = vld [vmem:[%s296_s2] ss:$0 sm:$0xff]  ;;  %v198_v14 = vunpack.c.l.bf16 %v197_v12  ;;  %v199_v17 = vunpack.c.h.bf16 %v197_v12 }
   0x5   :  { %v190_v41 = vld [vmem:[%s297_s4] ss:$0 sm:$0xff] }
   0x6   :  { %206 = vmatpush3.bf16.msra.mxu0 %v214_v2  ;;  %v191_v43 = vld [vmem:[%s298_s5] ss:$0 sm:$0xff] }
   0x8   :  { %v31_v4 = vld [vmem:[#allocation2] sm:$0xff]  ;;  %v32_v6 = vld [vmem:[#allocation2 + $0x8] sm:$0xff] }
   0x9   :  { %208 = vmatmul.mubr.msk.bf16.vlgmr.msra.gmra.mrb[0].mxu0 %vm28_vm0, %v215_v3 }
  0xdc   :  { %v94_v5 = vpop.f32.mrb[0].mxu0 }
  0xdd   :  { %v101_v7 = vadd.f32 %v94_v5, %v31_v4  ;;  %v209_v8 = vpop.f32.mrb[1].mxu0 }
  0xde   :  { %v97_v9 = vpop.f32.mrb[2].mxu0 }
  0xdf   :  { %103 = vst.msk [vmem:[#allocation2] sm:$0xff] %vm28_vm0, %v101_v7  ;;  %v102_v10 = vadd.f32 %v97_v9, %v32_v6  ;;  %v210_v11 = vpop.f32.mrb[3].mxu0 }
  0xe1   :  { %104 = vst.msk [vmem:[#allocation2 + $0x8] sm:$0xff] %vm28_vm0, %v102_v10 }
  0xe6   :  { %v108_v15 = vld [vmem:[#allocation2] sm:$0xff] }
  0xe7   :  { %v117_v16 = vadd.f32 %v189_v13, %v108_v15 }
  0xe8   :  { %v109_v18 = vld [vmem:[#allocation2 + $0x8] sm:$0xff] }
  0xe9   :  { %v123_v19 = vadd.f32 %v198_v14, %v117_v16  ;;  %v118_v20 = vadd.f32 %v189_v13, %v109_v18 }
  0xeb   :  { %v125_v21 = vsel %vm28_vm0, %v123_v19, 0.0  ;;  %v124_v22 = vadd.f32 %v199_v17, %v118_v20 }
  0xec   :  { %126 = vadd.xlane.f32.xlu0 %v125_v21 }
  0xed   :  { %v128_v23 = vsel %vm28_vm0, %v124_v22, 0.0 }
  0xf0   :  { %129 = vadd.xlane.f32.xlu0 %v128_v23 }
 0x179   :  { %v127_v24 = vpop.xlane.xlu0 %126 }
 0x17a   :  { %v132_v25 = vmul.f32 0.03125, %v127_v24 }
 0x17c   :  { %v134_v26 = vsub.f32 %v123_v19, %v132_v25 }
 0x17d   :  { %v130_v27 = vpop.xlane.xlu0 %129 }
 0x17e   :  { %v133_v28 = vmul.f32 0.03125, %v130_v27  ;;  %v136_v29 = vmul.f32 %v134_v26, %v134_v26 }
 0x180   :  { %v135_v30 = vsub.f32 %v124_v22, %v133_v28  ;;  %v138_v31 = vsel %vm28_vm0, %v136_v29, 0.0 }
 0x181   :  { %139 = vadd.xlane.f32.xlu1 %v138_v31 }
 0x182   :  { %v137_v32 = vmul.f32 %v135_v30, %v135_v30 }
 0x184   :  { %v141_v33 = vsel %vm28_vm0, %v137_v32, 0.0 }
 0x185   :  { %142 = vadd.xlane.f32.xlu1 %v141_v33 }
 0x20e   :  { %v140_v34 = vpop.xlane.xlu1 %139 }
 0x20f   :  { %v144_v35 = vmul.f32 0.03125, %v140_v34 }
 0x211   :  { %v146_v36 = vadd.f32 1e-05, %v144_v35 }
 0x212   :  { %v143_v37 = vpop.xlane.xlu1 %142 }
 0x213   :  { %216 = vrsqrt.f32 %v146_v36  ;;  %v145_v38 = vmul.f32 0.03125, %v143_v37 }
 0x215   :  { %v147_v39 = vadd.f32 1e-05, %v145_v38 }
 0x217   :  { %218 = vrsqrt.f32 %v147_v39 }
 0x21d   :  { %v217_v40 = vpop.eup %216 }
 0x21e   :  { %v150_v42 = vmul.f32 %v217_v40, %v134_v26 }
 0x220   :  { %v159_v44 = vmul.f32 %v190_v41, %v150_v42 }
 0x221   :  { %v219_v45 = vpop.eup %218 }
 0x222   :  { %v168_v46 = vadd.f32 %v191_v43, %v159_v44  ;;  %v151_v47 = vmul.f32 %v219_v45, %v135_v30 }
 0x224   :  { %v194_v48 = vpack.c.bf16 %v168_v46, %v168_v46  ;;  %v160_v49 = vmul.f32 %v190_v41, %v151_v47 }
 0x226   :  { %179 = vst.msk [vmem:[%s299_s6] sm:$0xf] %vm178_vm2, %v194_v48  ;;  %v169_v50 = vadd.f32 %v191_v43, %v160_v49 }
 0x228   :  { %v195_v51 = vpack.c.bf16 %v169_v50, %v169_v50 }
 0x22a   :  { %180 = vst.msk [vmem:[%s299_s6 + $0x4] sm:$0xf] %vm178_vm2, %v195_v51 }

// kernel: transformer_forward.24
= control target key start
LH: loop header
LB: loop body
LE: loop exit
PB: predicated region body
PF: predicated region fallthrough
CT: control target
= control target key end

     0   :  { %vm19_vm0 = vcmask 261120   ;;  %v150_v0 = vmov 0.0   ;;  %vm151_vm1 = vmmov 0   ;;  %vm118_vm2 = vcmask 257024   ;;  %s195_s1 = inlined_call_operand.vmem [shape: bf16[32,32], index: 1, kind: input, shape index: {}]   ;;  %s196_s0 = inlined_call_operand.vmem [shape: bf16[16,32], index: 0, kind: input, shape index: {}]   ;;  %s197_s2 = inlined_call_operand.vmem [shape: f32[1,32], index: 2, kind: input, shape index: {}]   ;;  %s198_s3 = inlined_call_operand.vmem [shape: bf16[16,32], index: 3, kind: output, shape index: {}]  }
   0x1   :  { %137 = vmatprep.subr.bf16.mxu0 %v150_v0  ;;  %v147_v1 = vld [vmem:[%s195_s1] sm:$0xff]   ;;  %141 = vmatprep.mubr.msk.bf16.mxu0 %vm151_vm1, %v150_v0  ;;  %20 = vst.msk [vmem:[#allocation2] sm:$0xff] %vm19_vm0, %v150_v0  ;;  %21 = vst.msk [vmem:[#allocation2 + $0x8] sm:$0xff] %vm19_vm0, %v150_v0  ;;  %v148_v2 = vld [vmem:[%s195_s1 + $0x8] sm:$0xff]  }
   0x2   :  { %138 = vmatpush3.bf16.msra.mxu0 %v147_v1  ;;  %v149_v3 = vld [vmem:[%s196_s0] sm:$0xff]  }
   0x3   :  { %139 = vmatprep.subr.bf16.mxu0 %v150_v0  ;;  %v129_v12 = vld [vmem:[%s197_s2] ss:$0 sm:$0xff] }
   0x6   :  { %140 = vmatpush3.bf16.msra.mxu0 %v148_v2 }
   0x8   :  { %v22_v4 = vld [vmem:[#allocation2] sm:$0xff]  ;;  %v23_v6 = vld [vmem:[#allocation2 + $0x8] sm:$0xff] }
   0x9   :  { %142 = vmatmul.mubr.msk.bf16.vlgmr.msra.gmra.mrb[0].mxu0 %vm19_vm0, %v149_v3 }
  0xdc   :  { %v85_v5 = vpop.f32.mrb[0].mxu0 }
  0xdd   :  { %v92_v7 = vadd.f32 %v85_v5, %v22_v4  ;;  %v143_v8 = vpop.f32.mrb[1].mxu0 }
  0xde   :  { %v88_v9 = vpop.f32.mrb[2].mxu0 }
  0xdf   :  { %94 = vst.msk [vmem:[#allocation2] sm:$0xff] %vm19_vm0, %v92_v7  ;;  %v93_v10 = vadd.f32 %v88_v9, %v23_v6  ;;  %v144_v11 = vpop.f32.mrb[3].mxu0 }
  0xe1   :  { %95 = vst.msk [vmem:[#allocation2 + $0x8] sm:$0xff] %vm19_vm0, %v93_v10 }
  0xe6   :  { %v99_v13 = vld [vmem:[#allocation2] sm:$0xff] }
  0xe7   :  { %v108_v14 = vadd.f32 %v129_v12, %v99_v13 }
  0xe8   :  { %v100_v15 = vld [vmem:[#allocation2 + $0x8] sm:$0xff] }
  0xe9   :  { %v132_v16 = vpack.c.bf16 %v108_v14, %v108_v14  ;;  %v109_v17 = vadd.f32 %v129_v12, %v100_v15 }
  0xeb   :  { %119 = vst.msk [vmem:[%s198_s3] sm:$0xf] %vm118_vm2, %v132_v16  ;;  %v133_v18 = vpack.c.bf16 %v109_v17, %v109_v17 }
  0xed   :  { %120 = vst.msk [vmem:[%s198_s3 + $0x4] sm:$0xf] %vm118_vm2, %v133_v18 }

// kernel: transformer_forward.20
= control target key start
LH: loop header
LB: loop body
LE: loop exit
PB: predicated region body
PF: predicated region fallthrough
CT: control target
= control target key end

     0   :  { %vm19_vm0 = vcmask 261120   ;;  %v211_v1 = vmov 0.0   ;;  %vm66_vm1 = vcmask 392192   ;;  %vm165_vm2 = vcmask 257024   ;;  %s270_s1 = inlined_call_operand.vmem [shape: bf16[48,32], index: 1, kind: input, shape index: {}]   ;;  %s271_s0 = inlined_call_operand.vmem [shape: bf16[32,48], index: 0, kind: input, shape index: {}]   ;;  %s272_s2 = inlined_call_operand.vmem [shape: f32[1,32], index: 2, kind: input, shape index: {}]   ;;  %s273_s3 = inlined_call_operand.vmem [shape: bf16[32,32], index: 3, kind: output, shape index: {}]  }
   0x1   :  { %v206_v0 = vld [vmem:[%s270_s1] sm:$0xff]   ;;  %22 = vst.msk [vmem:[#allocation2 + $0x10] sm:$0xff] %vm19_vm0, %v211_v1  ;;  %20 = vst.msk [vmem:[#allocation2] sm:$0xff] %vm19_vm0, %v211_v1  ;;  %v207_v2 = vld [vmem:[%s270_s1 + $0x8] sm:$0xff]  }
   0x2   :  { %21 = vst.msk [vmem:[#allocation2 + $0x8] sm:$0xff] %vm19_vm0, %v211_v1  ;;  %23 = vst.msk [vmem:[#allocation2 + $0x18] sm:$0xff] %vm19_vm0, %v211_v1  ;;  %195 = vmatprep.subr.bf16.mxu0 %v206_v0  ;;  %v209_v3 = vld [vmem:[%s271_s0] sm:$0xff]   ;;  %v208_v4 = vld [vmem:[%s270_s1 + $0x10] sm:$0xff]  }
   0x3   :  { %196 = vmatpush3.bf16.msra.mxu0 %v206_v0  ;;  %201 = vmatprep.mubr.msk.bf16.mxu0 %vm66_vm1, %v209_v3  ;;  %v210_v5 = vld [vmem:[%s271_s0 + $0x8] sm:$0xff]   ;;  %v181_v18 = vld [vmem:[%s272_s2] ss:$0 sm:$0xff] }
   0x4   :  { %197 = vmatprep.subr.bf16.mxu0 %v207_v2 }
   0x7   :  { %198 = vmatpush3.bf16.msra.mxu0 %v207_v2 }
   0x8   :  { %199 = vmatprep.subr.bf16.mxu0 %v208_v4  ;;  %v26_v6 = vld [vmem:[#allocation2 + $0x10] sm:$0xff]  ;;  %v24_v7 = vld [vmem:[#allocation2] sm:$0xff] }
   0x9   :  { %v27_v9 = vld [vmem:[#allocation2 + $0x18] sm:$0xff]  ;;  %v25_v12 = vld [vmem:[#allocation2 + $0x8] sm:$0xff] }
   0xb   :  { %200 = vmatpush3.bf16.msra.mxu0 %v208_v4 }
   0xe   :  { %202 = vmatmul.mubr.msk.bf16.vlgmr.msra.gmra.mrb[0].mxu0 %vm66_vm1, %v210_v5 }
  0xe1   :  { %v203_v8 = vpop.f32.mrb[0].mxu0 }
  0xe2   :  { %v124_v10 = vadd.f32 %v203_v8, %v26_v6  ;;  %v107_v11 = vpop.f32.mrb[1].mxu0 }
  0xe3   :  { %v122_v13 = vadd.f32 %v107_v11, %v24_v7  ;;  %v204_v14 = vpop.f32.mrb[2].mxu0 }
  0xe4   :  { %129 = vst.msk [vmem:[#allocation2 + $0x10] sm:$0xff] %vm19_vm0, %v124_v10  ;;  %v125_v15 = vadd.f32 %v204_v14, %v27_v9  ;;  %v110_v16 = vpop.f32.mrb[3].mxu0 }
  0xe5   :  { %127 = vst.msk [vmem:[#allocation2] sm:$0xff] %vm19_vm0, %v122_v13  ;;  %v123_v17 = vadd.f32 %v110_v16, %v25_v12 }
  0xe6   :  { %130 = vst.msk [vmem:[#allocation2 + $0x18] sm:$0xff] %vm19_vm0, %v125_v15 }
  0xe7   :  { %128 = vst.msk [vmem:[#allocation2 + $0x8] sm:$0xff] %vm19_vm0, %v123_v17 }
  0xeb   :  { %v136_v19 = vld [vmem:[#allocation2 + $0x10] sm:$0xff] }
  0xec   :  { %v147_v20 = vadd.f32 %v181_v18, %v136_v19  ;;  %v134_v21 = vld [vmem:[#allocation2] sm:$0xff] }
  0xed   :  { %v145_v22 = vadd.f32 %v181_v18, %v134_v21  ;;  %v137_v23 = vld [vmem:[#allocation2 + $0x18] sm:$0xff] }
  0xee   :  { %v188_v24 = vpack.c.bf16 %v147_v20, %v147_v20  ;;  %v148_v25 = vadd.f32 %v181_v18, %v137_v23  ;;  %v135_v26 = vld [vmem:[#allocation2 + $0x8] sm:$0xff] }
  0xef   :  { %v186_v27 = vpack.c.bf16 %v145_v22, %v145_v22  ;;  %v146_v28 = vadd.f32 %v181_v18, %v135_v26 }
  0xf0   :  { %168 = vst.msk [vmem:[%s273_s3 + $0x8] sm:$0xf] %vm165_vm2, %v188_v24  ;;  %v189_v29 = vpack.c.bf16 %v148_v25, %v148_v25 }
  0xf1   :  { %166 = vst.msk [vmem:[%s273_s3] sm:$0xf] %vm165_vm2, %v186_v27  ;;  %v187_v30 = vpack.c.bf16 %v146_v28, %v146_v28 }
  0xf2   :  { %169 = vst.msk [vmem:[%s273_s3 + $0xc] sm:$0xf] %vm165_vm2, %v189_v29 }
  0xf3   :  { %167 = vst.msk [vmem:[%s273_s3 + $0x4] sm:$0xf] %vm165_vm2, %v187_v30 }

// kernel: transformer_forward.25
= control target key start
LH: loop header
LB: loop body
LE: loop exit
PB: predicated region body
PF: predicated region fallthrough
CT: control target
= control target key end

     0   :  { %vm19_vm0 = vcmask 523264   ;;  %v198_v1 = vmov 0.0   ;;  %vm58_vm1 = vcmask 261120   ;;  %vm157_vm2 = vcmask 519168   ;;  %s254_s1 = inlined_call_operand.vmem [shape: bf16[32,64], index: 1, kind: input, shape index: {}]   ;;  %s255_s0 = inlined_call_operand.vmem [shape: bf16[32,32], index: 0, kind: input, shape index: {}]   ;;  %s256_s2 = inlined_call_operand.vmem [shape: f32[1,64], index: 2, kind: input, shape index: {}]   ;;  %s257_s3 = inlined_call_operand.vmem [shape: bf16[32,64], index: 3, kind: output, shape index: {}]  }
   0x1   :  { %v194_v0 = vld [vmem:[%s254_s1] sm:$0xff]   ;;  %22 = vst.msk [vmem:[#allocation2 + $0x10] sm:$0xff] %vm19_vm0, %v198_v1  ;;  %20 = vst.msk [vmem:[#allocation2] sm:$0xff] %vm19_vm0, %v198_v1  ;;  %v195_v2 = vld [vmem:[%s254_s1 + $0x8] sm:$0xff]  }
   0x2   :  { %21 = vst.msk [vmem:[#allocation2 + $0x8] sm:$0xff] %vm19_vm0, %v198_v1  ;;  %23 = vst.msk [vmem:[#allocation2 + $0x18] sm:$0xff] %vm19_vm0, %v198_v1  ;;  %185 = vmatprep.subr.bf16.mxu0 %v194_v0  ;;  %v196_v3 = vld [vmem:[%s255_s0] sm:$0xff]   ;;  %v197_v4 = vld [vmem:[%s255_s0 + $0x8] sm:$0xff]  }
   0x3   :  { %186 = vmatpush3.bf16.msra.mxu0 %v194_v0  ;;  %189 = vmatprep.mubr.msk.bf16.mxu0 %vm58_vm1, %v196_v3  ;;  %v172_v17 = vld [vmem:[%s256_s2] ss:$0 sm:$0xff] }
   0x4   :  { %187 = vmatprep.subr.bf16.mxu0 %v195_v2 }
   0x7   :  { %188 = vmatpush3.bf16.msra.mxu0 %v195_v2 }
   0x8   :  { %v26_v5 = vld [vmem:[#allocation2 + $0x10] sm:$0xff]  ;;  %v24_v6 = vld [vmem:[#allocation2] sm:$0xff] }
   0x9   :  { %v27_v8 = vld [vmem:[#allocation2 + $0x18] sm:$0xff]  ;;  %v25_v11 = vld [vmem:[#allocation2 + $0x8] sm:$0xff] }
   0xa   :  { %190 = vmatmul.mubr.msk.bf16.vlgmr.msra.gmra.mrb[0].mxu0 %vm58_vm1, %v197_v4 }
  0xdd   :  { %v191_v7 = vpop.f32.mrb[0].mxu0 }
  0xde   :  { %v116_v9 = vadd.f32 %v191_v7, %v26_v5  ;;  %v99_v10 = vpop.f32.mrb[1].mxu0 }
  0xdf   :  { %v114_v12 = vadd.f32 %v99_v10, %v24_v6  ;;  %v192_v13 = vpop.f32.mrb[2].mxu0 }
  0xe0   :  { %121 = vst.msk [vmem:[#allocation2 + $0x10] sm:$0xff] %vm19_vm0, %v116_v9  ;;  %v117_v14 = vadd.f32 %v192_v13, %v27_v8  ;;  %v102_v15 = vpop.f32.mrb[3].mxu0 }
  0xe1   :  { %119 = vst.msk [vmem:[#allocation2] sm:$0xff] %vm19_vm0, %v114_v12  ;;  %v115_v16 = vadd.f32 %v102_v15, %v25_v11 }
  0xe2   :  { %122 = vst.msk [vmem:[#allocation2 + $0x18] sm:$0xff] %vm19_vm0, %v117_v14 }
  0xe3   :  { %120 = vst.msk [vmem:[#allocation2 + $0x8] sm:$0xff] %vm19_vm0, %v115_v16 }
  0xe7   :  { %v128_v18 = vld [vmem:[#allocation2 + $0x10] sm:$0xff] }
  0xe8   :  { %v139_v19 = vadd.f32 %v172_v17, %v128_v18  ;;  %v126_v20 = vld [vmem:[#allocation2] sm:$0xff] }
  0xe9   :  { %v137_v21 = vadd.f32 %v172_v17, %v126_v20  ;;  %v129_v22 = vld [vmem:[#allocation2 + $0x18] sm:$0xff] }
  0xea   :  { %v179_v23 = vpack.c.bf16 %v139_v19, %v139_v19  ;;  %v140_v24 = vadd.f32 %v172_v17, %v129_v22  ;;  %v127_v25 = vld [vmem:[#allocation2 + $0x8] sm:$0xff] }
  0xeb   :  { %v177_v26 = vpack.c.bf16 %v137_v21, %v137_v21  ;;  %v138_v27 = vadd.f32 %v172_v17, %v127_v25 }
  0xec   :  { %160 = vst.msk [vmem:[%s257_s3 + $0x8] sm:$0xf] %vm157_vm2, %v179_v23  ;;  %v180_v28 = vpack.c.bf16 %v140_v24, %v140_v24 }
  0xed   :  { %158 = vst.msk [vmem:[%s257_s3] sm:$0xf] %vm157_vm2, %v177_v26  ;;  %v178_v29 = vpack.c.bf16 %v138_v27, %v138_v27 }
  0xee   :  { %161 = vst.msk [vmem:[%s257_s3 + $0xc] sm:$0xf] %vm157_vm2, %v180_v28 }
  0xef   :  { %159 = vst.msk [vmem:[%s257_s3 + $0x4] sm:$0xf] %vm157_vm2, %v178_v29 }

// kernel: transformer_forward.28
= control target key start
LH: loop header
LB: loop body
LE: loop exit
PB: predicated region body
PF: predicated region fallthrough
CT: control target
= control target key end

     0   :  { %vm19_vm0 = vcmask 523264   ;;  %v153_v0 = vmov 0.0   ;;  %vm154_vm1 = vmmov 0   ;;  %vm47_vm2 = vcmask 261120   ;;  %s197_s1 = inlined_call_operand.vmem [shape: bf16[32,64], index: 1, kind: input, shape index: {}]   ;;  %s198_s0 = inlined_call_operand.vmem [shape: bf16[16,32], index: 0, kind: input, shape index: {}]   ;;  %s199_s2 = inlined_call_operand.vmem [shape: f32[1,64], index: 2, kind: input, shape index: {}]   ;;  %s200_s3 = inlined_call_operand.vmem [shape: bf16[16,64], index: 3, kind: output, shape index: {}]  }
   0x1   :  { %140 = vmatprep.subr.bf16.mxu0 %v153_v0  ;;  %v150_v1 = vld [vmem:[%s197_s1] sm:$0xff]   ;;  %144 = vmatprep.mubr.msk.bf16.mxu0 %vm154_vm1, %v153_v0  ;;  %20 = vst.msk [vmem:[#allocation2] sm:$0xff] %vm19_vm0, %v153_v0  ;;  %21 = vst.msk [vmem:[#allocation2 + $0x8] sm:$0xff] %vm19_vm0, %v153_v0  ;;  %v151_v2 = vld [vmem:[%s197_s1 + $0x8] sm:$0xff]   ;;  %vm121_vm3 = vcmask 519168  }
   0x2   :  { %141 = vmatpush3.bf16.msra.mxu0 %v150_v1  ;;  %v152_v3 = vld [vmem:[%s198_s0] sm:$0xff]  }
   0x3   :  { %142 = vmatprep.subr.bf16.mxu0 %v153_v0  ;;  %v132_v12 = vld [vmem:[%s199_s2] ss:$0 sm:$0xff] }
   0x6   :  { %143 = vmatpush3.bf16.msra.mxu0 %v151_v2 }
   0x8   :  { %v22_v4 = vld [vmem:[#allocation2] sm:$0xff]  ;;  %v23_v6 = vld [vmem:[#allocation2 + $0x8] sm:$0xff] }
   0x9   :  { %145 = vmatmul.mubr.msk.bf16.vlgmr.msra.gmra.mrb[0].mxu0 %vm47_vm2, %v152_v3 }
  0xdc   :  { %v85_v5 = vpop.f32.mrb[0].mxu0 }
  0xdd   :  { %v92_v7 = vadd.f32 %v85_v5, %v22_v4  ;;  %v146_v8 = vpop.f32.mrb[1].mxu0 }
  0xde   :  { %v88_v9 = vpop.f32.mrb[2].mxu0 }
  0xdf   :  { %95 = vst.msk [vmem:[#allocation2] sm:$0xff] %vm19_vm0, %v92_v7  ;;  %v93_v10 = vadd.f32 %v88_v9, %v23_v6  ;;  %v147_v11 = vpop.f32.mrb[3].mxu0 }
  0xe1   :  { %96 = vst.msk [vmem:[#allocation2 + $0x8] sm:$0xff] %vm19_vm0, %v93_v10 }
  0xe6   :  { %v100_v13 = vld [vmem:[#allocation2] sm:$0xff] }
  0xe7   :  { %v109_v14 = vadd.f32 %v132_v12, %v100_v13 }
  0xe8   :  { %v101_v15 = vld [vmem:[#allocation2 + $0x8] sm:$0xff] }
  0xe9   :  { %v111_v16 = vmax.f32 %v109_v14, 0.0  ;;  %v110_v17 = vadd.f32 %v132_v12, %v101_v15 }
  0xeb   :  { %v135_v18 = vpack.c.bf16 %v111_v16, %v111_v16  ;;  %v112_v19 = vmax.f32 %v110_v17, 0.0 }
  0xed   :  { %122 = vst.msk [vmem:[%s200_s3] sm:$0xf] %vm121_vm3, %v135_v18  ;;  %v136_v20 = vpack.c.bf16 %v112_v19, %v112_v19 }
  0xef   :  { %123 = vst.msk [vmem:[%s200_s3 + $0x4] sm:$0xf] %vm121_vm3, %v136_v20 }

// kernel: transformer_forward.26
= control target key start
LH: loop header
LB: loop body
LE: loop exit
PB: predicated region body
PF: predicated region fallthrough
CT: control target
= control target key end

     0   :  { %s773_s15 = smov 0   ;;  %s775_s16 = smov 0   ;;  %s841_s0 = inlined_call_operand.vmem [shape: bf16[2,4,8,8], index: 0, kind: input, shape index: {}]   ;;  %s842_s1 = inlined_call_operand.vmem [shape: bf16[2,4,16,8], index: 1, kind: input, shape index: {}]   ;;  %s843_s2 = inlined_call_operand.vmem [shape: bf16[2,4,16,8], index: 2, kind: input, shape index: {}]   ;;  %s844_s3 = inlined_call_operand.vmem [shape: bf16[2,4,8,8], index: 3, kind: output, shape index: {0}]   ;;  %s845_s4 = inlined_call_operand.vmem [shape: bf16[2,4,8,16], index: 4, kind: output, shape index: {1}]  }
   0x1   :  { %s777_s17 = smov 0   ;;  %s779_s18 = smov 0  }
   0x2   :  { %s781_s19 = smov 0  }
   0x3 LB: > { %s24_s20 = sadd.s32 1, %s736_s17  ;;  %s27_s21 = sadd.s32 1, %s740_s18  ;;  %s744_s19 = sphi %s781_s19, %s15_s19   ;;  %s740_s18 = sphi %s779_s18, %s849_s18   ;;  %s736_s17 = sphi %s777_s17, %s848_s17   ;;  %s732_s16 = sphi %s775_s16, %s847_s16   ;;  %s728_s15 = sphi %s773_s15, %s846_s15  }
   0x4   : > { %p25_p0 = scmp.ge.s32.totalorder %s24_s20, 4  ;;  %p623_p1 = scmp.ge.s32.totalorder %s744_s19, 1 }
   0x5   : > { %p218_p2 = scmp.lt.s32.totalorder %s744_s19, 9 }
   0x6   : > { %s851_s20 = smov (%p25_p0, %s24_s20), 0  ;;  %s853_s21 = smov (!%p25_p0, %s27_s21), %s740_s18 }
   0x7   : > { %p219_p3 = pnand %p623_p1, %p218_p2  ;;  %p29_p4 = scmp.ge.s32.totalorder %s853_s21, 2 }
   0x8   : > { %p276_p5 = scmp.lt.s32.totalorder (!%p219_p3), %s732_s16, 1  ;;  %p278_p6 = scmp.lt.s32.totalorder (!%p219_p3), %s728_s15, 3  ;;  %v746_v0 = vmov (!%p219_p3), 0.0   ;;  %vm747_vm0 = vmmov (!%p219_p3), 0   ;;  %vm329_vm1 = vcmask (!%p219_p3), 64512   ;;  %vm377_vm2 = vcmask (!%p219_p3), 130048  }
   0x9   : > { %s855_s21 = smov (%p29_p4, %s853_s21), 0  ;;  %222 = sbr.rel (%p219_p3) target bundleno = 776 (0x308), region = 32 }
   0xa   : > { %646 = vmatprep.subr.bf16.mxu0 (!%p219_p3), %v746_v0  ;;  %648 = vmatprep.mubr.msk.bf16.mxu0 (!%p219_p3), %vm747_vm0, %v746_v0  ;;  %vm390_vm3 = vcmask (!%p219_p3), 125952   ;;  %vm442_vm4 = vcmask (!%p219_p3), 60416  }
   0xb   : > { %652 = vmatprep.subr.bf16.mxu1 (!%p219_p3), %v746_v0  ;;  %654 = vmatprep.mubr.msk.bf16.mxu1 (!%p219_p3), %vm747_vm0, %v746_v0 }
  0x10   : > { %s857_s16 = smov (!%p276_p5, %s732_s16), 1  ;;  %s859_s15 = smov (!%p278_p6, %s728_s15), 3 }
  0x11   : > { %s627_s22 = sshll.u32 %s857_s16, 3  ;;  %s624_s23 = sshll.u32 %s857_s16, 2 }
  0x12   : > { %s626_s24 = sshll.u32 %s859_s15, 1  ;;  %s281_s27 = sadd.s32 %s624_s23, %s859_s15 }
  0x13   : > { %s290_s25 = sadd.s32 %s627_s22, %s626_s24  ;;  %s806_s5 = sshll.u32 %s281_s27, 2 }
  0x14   : > { %s628_s26 = sshll.u32 %s290_s25, 2  ;;  %s283_s8 = scalar_lea.vmem %s841_s0, %s806_s5 }
  0x15   : > { %s292_s30 = scalar_lea.vmem %s842_s1, %s628_s26  ;;  %v319_v3 = vld [vmem:[%s283_s8] sm:$0xf]  ;;  %s301_s11 = scalar_lea.vmem %s843_s2, %s628_s26 }
  0x16   : > { %v700_v1 = vld [vmem:[%s292_s30] sm:$0xff]   ;;  %s317_s14 = scalar_lea.vmem %s845_s4, %s806_s5  ;;  %s309_s22 = scalar_lea.vmem %s844_s3, %s806_s5 }
  0x17   : > { %v334_v2 = vsel %vm329_vm1, %v700_v1, 0  ;;  %v701_v15 = vld [vmem:[%s301_s11] sm:$0xff]  }
  0x18   : > { %647 = vmatpush3.bf16.xpose.msra.mxu0 %v334_v2  ;;  %653 = vmatpush3.bf16.msra.mxu1 %v701_v15 }
  0x1f   : > { %649 = vmatmul.mubr.msk.bf16.vlgmr.msra.gmra.mrb[0].mxu0 %vm329_vm1, %v319_v3 }
  0xf2   : > { %v370_v4 = vpop.f32.mrb[0].mxu0 }
  0xf3   : > { %v376_v5 = vmul.f32 0.35355338, %v370_v4  ;;  %v650_v6 = vpop.f32.mrb[1].mxu0 }
  0xf4   : > { %v373_v7 = vpop.f32.mrb[2].mxu0 }
  0xf5   : > { %v651_v8 = vpop.f32.mrb[3].mxu0  ;;  %v378_v9 = vsel %vm377_vm2, %v376_v5, -inf }
  0xf6   : > { %379 = vmax.xlane.f32.xlu0 %v378_v9 }
 0x183   : > { %v380_v10 = vpop.xlane.xlu0 %379 }
 0x184   : > { %v381_v11 = vsub.f32 %v376_v5, %v380_v10 }
 0x186   : > { %v382_v12 = vmul.f32 1.442695, %v381_v11 }
 0x188   : > { %702 = vpow2.f32 %v382_v12 }
 0x192   : > { %v703_v13 = vpop.eup %702 }
 0x193   : > { %v384_v14 = vsel %vm377_vm2, %v703_v13, 0.0 }
 0x194   : > { %385 = vadd.xlane.f32.xlu0 %v384_v14 }
 0x221   : > { %v386_v16 = vpop.xlane.xlu0 %385 }
 0x222   : > { %704 = vrcp.f32 %v386_v16 }
 0x22c   : > { %v705_v17 = vpop.eup %704 }
 0x22d   : > { %v388_v18 = vmul.f32 %v705_v17, %v703_v13 }
 0x22f   : > { %v389_v19 = vpack.c.bf16 %v388_v18, %v388_v18 }
 0x231   : > { %391 = vst.msk [vmem:[%s317_s14] sm:$0xf] %vm390_vm3, %v389_v19  ;;  %655 = vmatmul.mubr.msk.bf16.vlgmr.msra.gmra.mrb[0].mxu1 %vm377_vm2, %v389_v19 }
 0x304   : > { %v435_v20 = vpop.f32.mrb[0].mxu1 }
 0x305   : > { %v441_v21 = vpack.c.bf16 %v435_v20, %v435_v20  ;;  %v656_v22 = vpop.f32.mrb[1].mxu1 }
 0x306   : > { %v438_v23 = vpop.f32.mrb[2].mxu1 }
 0x307   : > { %443 = vst.msk [vmem:[%s309_s22] sm:$0xf] %vm442_vm4, %v441_v21  ;;  %v657_v24 = vpop.f32.mrb[3].mxu1 }
 0x308 PF: > { %s15_s19 = sadd.s32 1, %s744_s19   ;;  %s846_s15 = smov %s736_s17 }
 0x309   : > { %p12_p7 = scmp.ge.s32.totalorder %s15_s19, 10   ;;  %s847_s16 = smov %s740_s18 }
 0x30a   : > { %s848_s17 = smov %s851_s20  ;;  %s849_s18 = smov %s855_s21 }
 0x30b   :  { %14 = sbr.rel (!%p12_p7) target bundleno = 3 (0x3), region = 80 }

// kernel: transformer_forward.29
= control target key start
LH: loop header
LB: loop body
LE: loop exit
PB: predicated region body
PF: predicated region fallthrough
CT: control target
= control target key end

     0   :  { %vm28_vm0 = vcmask 261120   ;;  %v247_v0 = vmov 0.0   ;;  %vm248_vm1 = vmmov 0   ;;  %vm72_vm2 = vcmask 523264   ;;  %s325_s1 = inlined_call_operand.vmem [shape: bf16[64,32], index: 1, kind: input, shape index: {}]   ;;  %s326_s0 = inlined_call_operand.vmem [shape: bf16[16,64], index: 0, kind: input, shape index: {}]   ;;  %s327_s3 = inlined_call_operand.vmem [shape: bf16[16,32], index: 3, kind: input, shape index: {}]   ;;  %s328_s2 = inlined_call_operand.vmem [shape: f32[1,32], index: 2, kind: input, shape index: {}]   ;;  %s329_s4 = inlined_call_operand.vmem [shape: f32[1,32], index: 4, kind: input, shape index: {}]   ;;  %s330_s5 = inlined_call_operand.vmem [shape: f32[1,32], index: 5, kind: input, shape index: {}]   ;;  %s331_s6 = inlined_call_operand.vmem [shape: bf16[16,32], index: 6, kind: output, shape index: {}]  }
   0x1   :  { %224 = vmatprep.subr.bf16.mxu0 %v247_v0  ;;  %v238_v1 = vld [vmem:[%s325_s1] sm:$0xff]   ;;  %232 = vmatprep.mubr.msk.bf16.mxu0 %vm248_vm1, %v247_v0  ;;  %29 = vst.msk [vmem:[#allocation2] sm:$0xff] %vm28_vm0, %v247_v0  ;;  %30 = vst.msk [vmem:[#allocation2 + $0x8] sm:$0xff] %vm28_vm0, %v247_v0  ;;  %v239_v2 = vld [vmem:[%s325_s1 + $0x8] sm:$0xff]   ;;  %vm195_vm3 = vcmask 257024  }
   0x2   :  { %225 = vmatpush3.bf16.msra.mxu0 %v238_v1  ;;  %v240_v3 = vld [vmem:[%s325_s1 + $0x10] sm:$0xff]   ;;  %v241_v4 = vld [vmem:[%s325_s1 + $0x18] sm:$0xff]   ;;  %v242_v5 = vld [vmem:[%s326_s0] sm:$0xff]  }
   0x3   :  { %226 = vmatprep.subr.bf16.mxu0 %v247_v0  ;;  %v216_v14 = vld [vmem:[%s327_s3] sm:$0xff]  }
   0x4   :  { %v208_v15 = vld [vmem:[%s328_s2] ss:$0 sm:$0xff]  ;;  %v217_v16 = vunpack.c.l.bf16 %v216_v14  ;;  %v218_v19 = vunpack.c.h.bf16 %v216_v14 }
   0x5   :  { %v209_v43 = vld [vmem:[%s329_s4] ss:$0 sm:$0xff] }
   0x6   :  { %227 = vmatpush3.bf16.msra.mxu0 %v239_v2  ;;  %v210_v45 = vld [vmem:[%s330_s5] ss:$0 sm:$0xff] }
   0x7   :  { %228 = vmatprep.subr.bf16.mxu0 %v247_v0 }
   0x8   :  { %v31_v6 = vld [vmem:[#allocation2] sm:$0xff]  ;;  %v32_v8 = vld [vmem:[#allocation2 + $0x8] sm:$0xff] }
   0xa   :  { %229 = vmatpush3.bf16.msra.mxu0 %v240_v3 }
   0xb   :  { %230 = vmatprep.subr.bf16.mxu0 %v247_v0 }
   0xe   :  { %231 = vmatpush3.bf16.msra.mxu0 %v241_v4 }
  0x11   :  { %233 = vmatmul.mubr.msk.bf16.vlgmr.msra.gmra.mrb[0].mxu0 %vm72_vm2, %v242_v5 }
  0xe4   :  { %v110_v7 = vpop.f32.mrb[0].mxu0 }
  0xe5   :  { %v117_v9 = vadd.f32 %v110_v7, %v31_v6  ;;  %v234_v10 = vpop.f32.mrb[1].mxu0 }
  0xe6   :  { %v113_v11 = vpop.f32.mrb[2].mxu0 }
  0xe7   :  { %120 = vst.msk [vmem:[#allocation2] sm:$0xff] %vm28_vm0, %v117_v9  ;;  %v118_v12 = vadd.f32 %v113_v11, %v32_v8  ;;  %v235_v13 = vpop.f32.mrb[3].mxu0 }
  0xe9   :  { %121 = vst.msk [vmem:[#allocation2 + $0x8] sm:$0xff] %vm28_vm0, %v118_v12 }
  0xee   :  { %v125_v17 = vld [vmem:[#allocation2] sm:$0xff] }
  0xef   :  { %v134_v18 = vadd.f32 %v208_v15, %v125_v17 }
  0xf0   :  { %v126_v20 = vld [vmem:[#allocation2 + $0x8] sm:$0xff] }
  0xf1   :  { %v140_v21 = vadd.f32 %v217_v16, %v134_v18  ;;  %v135_v22 = vadd.f32 %v208_v15, %v126_v20 }
  0xf3   :  { %v142_v23 = vsel %vm28_vm0, %v140_v21, 0.0  ;;  %v141_v24 = vadd.f32 %v218_v19, %v135_v22 }
  0xf4   :  { %143 = vadd.xlane.f32.xlu0 %v142_v23 }
  0xf5   :  { %v145_v25 = vsel %vm28_vm0, %v141_v24, 0.0 }
  0xf8   :  { %146 = vadd.xlane.f32.xlu0 %v145_v25 }
 0x181   :  { %v144_v26 = vpop.xlane.xlu0 %143 }
 0x182   :  { %v149_v27 = vmul.f32 0.03125, %v144_v26 }
 0x184   :  { %v151_v28 = vsub.f32 %v140_v21, %v149_v27 }
 0x185   :  { %v147_v29 = vpop.xlane.xlu0 %146 }
 0x186   :  { %v150_v30 = vmul.f32 0.03125, %v147_v29  ;;  %v153_v31 = vmul.f32 %v151_v28, %v151_v28 }
 0x188   :  { %v152_v32 = vsub.f32 %v141_v24, %v150_v30  ;;  %v155_v33 = vsel %vm28_vm0, %v153_v31, 0.0 }
 0x189   :  { %156 = vadd.xlane.f32.xlu1 %v155_v33 }
 0x18a   :  { %v154_v34 = vmul.f32 %v152_v32, %v152_v32 }
 0x18c   :  { %v158_v35 = vsel %vm28_vm0, %v154_v34, 0.0 }
 0x18d   :  { %159 = vadd.xlane.f32.xlu1 %v158_v35 }
 0x216   :  { %v157_v36 = vpop.xlane.xlu1 %156 }
 0x217   :  { %v161_v37 = vmul.f32 0.03125, %v157_v36 }
 0x219   :  { %v163_v38 = vadd.f32 1e-05, %v161_v37 }
 0x21a   :  { %v160_v39 = vpop.xlane.xlu1 %159 }
 0x21b   :  { %243 = vrsqrt.f32 %v163_v38  ;;  %v162_v40 = vmul.f32 0.03125, %v160_v39 }
 0x21d   :  { %v164_v41 = vadd.f32 1e-05, %v162_v40 }
 0x21f   :  { %245 = vrsqrt.f32 %v164_v41 }
 0x225   :  { %v244_v42 = vpop.eup %243 }
 0x226   :  { %v167_v44 = vmul.f32 %v244_v42, %v151_v28 }
 0x228   :  { %v176_v46 = vmul.f32 %v209_v43, %v167_v44 }
 0x229   :  { %v246_v47 = vpop.eup %245 }
 0x22a   :  { %v185_v48 = vadd.f32 %v210_v45, %v176_v46  ;;  %v168_v49 = vmul.f32 %v246_v47, %v152_v32 }
 0x22c   :  { %v213_v50 = vpack.c.bf16 %v185_v48, %v185_v48  ;;  %v177_v51 = vmul.f32 %v209_v43, %v168_v49 }
 0x22e   :  { %196 = vst.msk [vmem:[%s331_s6] sm:$0xf] %vm195_vm3, %v213_v50  ;;  %v186_v52 = vadd.f32 %v210_v45, %v177_v51 }
 0x230   :  { %v214_v53 = vpack.c.bf16 %v186_v52, %v186_v52 }
 0x232   :  { %197 = vst.msk [vmem:[%s331_s6 + $0x4] sm:$0xf] %vm195_vm3, %v214_v53 }

// kernel: transformer_forward.39
= control target key start
LH: loop header
LB: loop body
LE: loop exit
PB: predicated region body
PF: predicated region fallthrough
CT: control target
= control target key end

     0   :  { %vm19_vm0 = vcmask 408576   ;;  %v138_v0 = vmov 0.0   ;;  %vm139_vm1 = vmmov 0   ;;  %vm47_vm2 = vcmask 261120   ;;  %s184_s1 = inlined_call_operand.vmem [shape: bf16[32,50], index: 1, kind: input, shape index: {}]   ;;  %s185_s0 = inlined_call_operand.vmem [shape: bf16[16,32], index: 0, kind: input, shape index: {}]   ;;  %s186_s2 = inlined_call_operand.vmem [shape: f32[1,50], index: 2, kind: input, shape index: {}]   ;;  %s187_s3 = inlined_call_operand.vmem [shape: f32[16,50], index: 3, kind: output, shape index: {}]  }
   0x1   :  { %125 = vmatprep.subr.bf16.mxu0 %v138_v0  ;;  %v135_v1 = vld [vmem:[%s184_s1] sm:$0xff]   ;;  %129 = vmatprep.mubr.msk.bf16.mxu0 %vm139_vm1, %v138_v0  ;;  %20 = vst.msk [vmem:[#allocation2] sm:$0xff] %vm19_vm0, %v138_v0  ;;  %21 = vst.msk [vmem:[#allocation2 + $0x8] sm:$0xff] %vm19_vm0, %v138_v0  ;;  %v136_v2 = vld [vmem:[%s184_s1 + $0x8] sm:$0xff]  }
   0x2   :  { %126 = vmatpush3.bf16.msra.mxu0 %v135_v1  ;;  %v137_v3 = vld [vmem:[%s185_s0] sm:$0xff]  }
   0x3   :  { %127 = vmatprep.subr.bf16.mxu0 %v138_v0  ;;  %v121_v12 = vld [vmem:[%s186_s2] ss:$0 sm:$0xff] }
   0x6   :  { %128 = vmatpush3.bf16.msra.mxu0 %v136_v2 }
   0x8   :  { %v22_v4 = vld [vmem:[#allocation2] sm:$0xff]  ;;  %v23_v6 = vld [vmem:[#allocation2 + $0x8] sm:$0xff] }
   0x9   :  { %130 = vmatmul.mubr.msk.bf16.vlgmr.msra.gmra.mrb[0].mxu0 %vm47_vm2, %v137_v3 }
  0xdc   :  { %v85_v5 = vpop.f32.mrb[0].mxu0 }
  0xdd   :  { %v92_v7 = vadd.f32 %v85_v5, %v22_v4  ;;  %v131_v8 = vpop.f32.mrb[1].mxu0 }
  0xde   :  { %v88_v9 = vpop.f32.mrb[2].mxu0 }
  0xdf   :  { %95 = vst.msk [vmem:[#allocation2] sm:$0xff] %vm19_vm0, %v92_v7  ;;  %v93_v10 = vadd.f32 %v88_v9, %v23_v6  ;;  %v132_v11 = vpop.f32.mrb[3].mxu0 }
  0xe1   :  { %96 = vst.msk [vmem:[#allocation2 + $0x8] sm:$0xff] %vm19_vm0, %v93_v10 }
  0xe6   :  { %v100_v13 = vld [vmem:[#allocation2] sm:$0xff] }
  0xe7   :  { %v109_v14 = vadd.f32 %v121_v12, %v100_v13 }
  0xe8   :  { %v101_v15 = vld [vmem:[#allocation2 + $0x8] sm:$0xff] }
  0xe9   :  { %111 = vst.msk [vmem:[%s187_s3] sm:$0xff] %vm19_vm0, %v109_v14  ;;  %v110_v16 = vadd.f32 %v121_v12, %v101_v15 }
  0xeb   :  { %112 = vst.msk [vmem:[%s187_s3 + $0x8] sm:$0xff] %vm19_vm0, %v110_v16 }

</bundles_post_ra>
